<compile_context>
chip_gen: v5e
topology: v5e:2x2
jax: 0.10.0
libtpu: 0.0.40
codegen_flags: <defaults>
</compile_context>

<pallas_src>
import random as pyrandom

import jax
import jax.numpy as jnp
from jax import lax
from jax.experimental import pallas as pl
from jax.experimental.pallas import tpu as pltpu

VMEM = pl.BlockSpec(memory_space=pltpu.MemorySpace.VMEM)


# ----------------------------------------------------------------------------
# Encoder kernel: bidirectional GRU + enc->dec hidden projection + hoisted
# attention projection (e_part), all in one pallas_call.
# ----------------------------------------------------------------------------
def _encoder_kernel(emb_ref,                                   # [S, B, Et]
                    wih_f_ref, whh_f_ref, brz_f_ref, bn_f_ref, # fwd GRU (per-gate)
                    wih_b_ref, whh_b_ref, brz_b_ref, bn_b_ref, # bwd GRU (per-gate)
                    wae_f_ref, wae_b_ref, att_ba_ref,          # attention projection
                    fc_wf_ref, fc_wb_ref, fc_b_ref,            # enc->dec hidden fc
                    enc_cat_ref,                               # out [S, B, 2He]
                    e_part_ref,                                # out [S, B, Hd]
                    h0_dec_ref,                                # out [B, Hd]
                    outs_f_scr, outs_b_scr):                   # scratch [S, B, He]
    S, B, _ = emb_ref.shape
    He = whh_f_ref.shape[-1]
    Hd = wae_f_ref.shape[-1]

    # Hoisted, loop-invariant biases (r/z already combined bih+bhh).
    br_f, bz_f = brz_f_ref[0], brz_f_ref[1]
    bxn_f, bhn_f = bn_f_ref[0], bn_f_ref[1]
    br_b, bz_b = brz_b_ref[0], brz_b_ref[1]
    bxn_b, bhn_b = bn_b_ref[0], bn_b_ref[1]

    def cell(x, h, wih_ref, whh_ref, br, bz, bxn, bhn):
        # Per-gate, lane-aligned weights (gate order r, z, n); PyTorch GRU math.
        r = jax.nn.sigmoid(
            jnp.dot(x, wih_ref[0], preferred_element_type=jnp.float32)
            + jnp.dot(h, whh_ref[0], preferred_element_type=jnp.float32) + br)
        z = jax.nn.sigmoid(
            jnp.dot(x, wih_ref[1], preferred_element_type=jnp.float32)
            + jnp.dot(h, whh_ref[1], preferred_element_type=jnp.float32) + bz)
        n = jnp.tanh(
            jnp.dot(x, wih_ref[2], preferred_element_type=jnp.float32) + bxn
            + r * (jnp.dot(h, whh_ref[2], preferred_element_type=jnp.float32) + bhn))
        return (1.0 - z) * n + z * h

    h_init = jnp.zeros((B, He), jnp.float32)

    def step(s, carry):
        h_f, h_b = carry
        h_f = cell(emb_ref[s], h_f, wih_f_ref, whh_f_ref, br_f, bz_f, bxn_f, bhn_f)
        h_b = cell(emb_ref[S - 1 - s], h_b, wih_b_ref, whh_b_ref,
                   br_b, bz_b, bxn_b, bhn_b)
        outs_f_scr[s] = h_f
        outs_b_scr[S - 1 - s] = h_b
        return (h_f, h_b)

    h_f, h_b = lax.fori_loop(0, S, step, (h_init, h_init))

    of = outs_f_scr[...]                       # [S, B, He]
    ob = outs_b_scr[...]

    # enc_outputs = concat(fwd, bwd) on the feature axis (two static-slice stores).
    enc_cat_ref[:, :, 0:He] = of
    enc_cat_ref[:, :, He:2 * He] = ob

    # Loop-invariant attention projection, computed ONCE here instead of per
    # decoder step:  e_part = enc @ Wae + ba  (Wae split into fwd/bwd halves).
    of2 = of.reshape(S * B, He)
    ob2 = ob.reshape(S * B, He)
    e_part = (jnp.dot(of2, wae_f_ref[...], preferred_element_type=jnp.float32)
              + jnp.dot(ob2, wae_b_ref[...], preferred_element_type=jnp.float32)
              + att_ba_ref[...])
    e_part_ref[...] = e_part.reshape(S, B, Hd)

    # Decoder initial hidden: tanh([h_f ; h_b] @ Wfc + b) with Wfc split.
    h0_dec_ref[...] = jnp.tanh(
        jnp.dot(h_f, fc_wf_ref[...], preferred_element_type=jnp.float32)
        + jnp.dot(h_b, fc_wb_ref[...], preferred_element_type=jnp.float32)
        + fc_b_ref[...])


# ----------------------------------------------------------------------------
# Fused decoder kernel: the whole target-length loop (attention + GRU cell +
# output linear + argmax + teacher forcing + next-token embedding) runs inside
# one pallas_call with an in-kernel fori_loop.
# ----------------------------------------------------------------------------
def _decoder_kernel(targets_ref,               # [T, B, 1] f32 (token ids)
                    tf_ref,                    # [T, 1, 1] f32 (teacher-forcing mask)
                    enc_ref,                   # [B, S, 2He]
                    epart_ref,                 # [B, S, Hd]  (enc@Wae + ba, precomputed)
                    h0_ref,                    # [B, Hd]
                    dec_emb_ref,               # [n_out, Ed]
                    wah_ref, v_ref,            # [Hd, Hd], [1, Hd]
                    we_ref, wc_ref, whh_ref,   # [3,Ed,Hd], [3,2He,Hd], [3,Hd,Hd]
                    brz_ref, bn_ref,           # [2,1,Hd], [2,1,Hd]
                    wo_h_ref, wo_c_ref, wo_e_ref, bo_ref,   # output linear (split)
                    logits_ref,                # out [T, B, n_out]
                    att_ref):                  # out [T-1, B, S]
    T = targets_ref.shape[0]
    B, S, _ = enc_ref.shape
    n_out = logits_ref.shape[-1]

    # Hoisted loop invariants.
    enc = enc_ref[...]                         # [B, S, 2He]
    e_part = epart_ref[...]                    # [B, S, Hd]
    dec_emb = dec_emb_ref[...]                 # [n_out, Ed]
    wah = wah_ref[...]
    v = v_ref[...]
    br, bz = brz_ref[0], brz_ref[1]
    bxn, bhn = bn_ref[0], bn_ref[1]
    bo = bo_ref[...]
    col_f = lax.broadcasted_iota(jnp.int32, (B, n_out), 1).astype(jnp.float32)

    # outputs[:, :, 0] stays zero (as in the reference).
    logits_ref[0] = jnp.zeros((B, n_out), jnp.float32)

    def step(t, carry):
        h, tok = carry                         # [B, Hd] f32, [B, 1] f32 (token id)

        # Embedding lookup via one-hot matmul (keeps everything in VMEM/vregs).
        onehot = (tok == col_f).astype(jnp.float32)                    # [B, n_out]
        emb = jnp.dot(onehot, dec_emb, preferred_element_type=jnp.float32)  # [B, Ed]

        # --- additive attention (enc projection hoisted to encoder) ---
        h_part = jnp.dot(h, wah, preferred_element_type=jnp.float32)   # [B, Hd]
        energy = jnp.tanh(h_part[:, None, :] + e_part)                 # [B, S, Hd]
        scores = jnp.sum(energy * v[None, :, :], axis=-1)              # [B, S]
        scores = scores - jnp.max(scores, axis=-1, keepdims=True)
        exp_s = jnp.exp(scores)
        att = exp_s / jnp.sum(exp_s, axis=-1, keepdims=True)           # [B, S]
        ctx = jnp.sum(att[:, :, None] * enc, axis=1)                   # [B, 2He]

        # --- GRU cell, per-gate lane-aligned weights (input = [emb ; ctx]) ---
        def gx(g):
            return (jnp.dot(emb, we_ref[g], preferred_element_type=jnp.float32)
                    + jnp.dot(ctx, wc_ref[g], preferred_element_type=jnp.float32))

        def gh(g):
            return jnp.dot(h, whh_ref[g], preferred_element_type=jnp.float32)

        r = jax.nn.sigmoid(gx(0) + gh(0) + br)
        z = jax.nn.sigmoid(gx(1) + gh(1) + bz)
        n = jnp.tanh(gx(2) + bxn + r * (gh(2) + bhn))
        h_new = (1.0 - z) * n + z * h

        # --- output projection ([h ; ctx ; emb] @ W split into three dots) ---
        out = (jnp.dot(h_new, wo_h_ref[...], preferred_element_type=jnp.float32)
               + jnp.dot(ctx, wo_c_ref[...], preferred_element_type=jnp.float32)
               + jnp.dot(emb, wo_e_ref[...], preferred_element_type=jnp.float32)
               + bo)                                                   # [B, n_out]

        logits_ref[t] = out
        att_ref[t - 1] = att

        # --- next token: argmax (first-max index) vs teacher forcing ---
        m = jnp.max(out, axis=1, keepdims=True)
        pred = jnp.min(jnp.where(out == m, col_f, float(n_out)),
                       axis=1, keepdims=True)                          # [B, 1]
        tok_next = jnp.where(tf_ref[t] > 0.5, targets_ref[t], pred)    # [B, 1]
        return (h_new, tok_next)

    lax.fori_loop(1, T, step, (h0_ref[...], targets_ref[0]))


# ----------------------------------------------------------------------------
# pallas_call wrappers
# ----------------------------------------------------------------------------
def encoder_forward(params, inputs):
    B, S = inputs.shape
    He = params["enc_whh_f"].shape[-1]
    Hd = params["att_wae_f"].shape[-1]

    # TODO(synk): embedding gather kept as a single XLA take; at production
    # vocab sizes use an in-kernel HBM row-gather (pl.ANY + make_async_copy).
    emb_tm = jnp.transpose(jnp.take(params["enc_emb"], inputs, axis=0), (1, 0, 2))

    enc_cat_tm, e_part_tm, h0_dec = pl.pallas_call(
        _encoder_kernel,
        out_shape=(jax.ShapeDtypeStruct((S, B, 2 * He), jnp.float32),
                   jax.ShapeDtypeStruct((S, B, Hd), jnp.float32),
                   jax.ShapeDtypeStruct((B, Hd), jnp.float32)),
        in_specs=[VMEM] * 15,
        out_specs=(VMEM, VMEM, VMEM),
        scratch_shapes=[pltpu.VMEM((S, B, He), jnp.float32),
                        pltpu.VMEM((S, B, He), jnp.float32)],
    )(emb_tm,
      params["enc_wih_f"], params["enc_whh_f"], params["enc_brz_f"], params["enc_bn_f"],
      params["enc_wih_b"], params["enc_whh_b"], params["enc_brz_b"], params["enc_bn_b"],
      params["att_wae_f"], params["att_wae_b"], params["att_ba"],
      params["enc_fc_wf"], params["enc_fc_wb"], params["enc_fc_b"])

    enc_cat = jnp.transpose(enc_cat_tm, (1, 0, 2))     # [B, S, 2He]
    e_part = jnp.transpose(e_part_tm, (1, 0, 2))       # [B, S, Hd]
    return enc_cat, e_part, h0_dec


def decoder_forward(params, targets, tf_mask, enc_cat, e_part, h0_dec):
    B, T = targets.shape
    S = enc_cat.shape[1]
    n_out = params["dec_emb"].shape[0]

    targets_tm = jnp.transpose(targets, (1, 0))[:, :, None].astype(jnp.float32)  # [T,B,1]
    tf_arr = tf_mask.astype(jnp.float32)[:, None, None]                          # [T,1,1]

    logits_tm, att_tm = pl.pallas_call(
        _decoder_kernel,
        out_shape=(jax.ShapeDtypeStruct((T, B, n_out), jnp.float32),
                   jax.ShapeDtypeStruct((T - 1, B, S), jnp.float32)),
        in_specs=[VMEM] * 17,
        out_specs=(VMEM, VMEM),
    )(targets_tm, tf_arr, enc_cat, e_part, h0_dec,
      params["dec_emb"], params["att_wah"], params["att_v"],
      params["dec_we"], params["dec_wc"], params["dec_whh"],
      params["dec_brz"], params["dec_bn"],
      params["fc_out_wh"], params["fc_out_wc"], params["fc_out_we"],
      params["fc_out_b"])

    outputs = jnp.transpose(logits_tm, (1, 2, 0))      # [B, n_out, T]
    att_table = jnp.transpose(att_tm, (1, 0, 2))       # [B, T-1, S]
    return outputs, att_table


@jax.jit
def _seq2seq_core(params, inputs, targets, tf_mask):
    enc_cat, e_part, h0_dec = encoder_forward(params, inputs)
    return decoder_forward(params, targets, tf_mask, enc_cat, e_part, h0_dec)


def seq2seq_forward(params, inputs, targets, tf_ratio=0.5, tf_seed=0):
    """inputs: [B, src_len] int32, targets: [B, trg_len] int32."""
    T = targets.shape[1]
    # TODO(synk): random.random() teacher forcing replaced by a deterministic
    # seeded host RNG; the mask is passed into the kernel (runtime select).
    rng = pyrandom.Random(tf_seed)
    tf_mask = jnp.array(
        [0.0] + [1.0 if rng.random() < tf_ratio else 0.0 for _ in range(1, T)],
        dtype=jnp.float32)
    return _seq2seq_core(params, inputs, targets, tf_mask)


# ----------------------------------------------------------------------------
# Parameter init (deterministic, kernel-friendly per-gate layout)
# ----------------------------------------------------------------------------
def init_params(key, n_vocab, n_embed_text, n_embed_dec, n_hidden_enc,
                n_hidden_dec, n_output):
    def nrm(k, shape, scale=0.1):
        return (scale * jax.random.normal(k, shape)).astype(jnp.float32)

    ks = iter(jax.random.split(key, 32))
    He, Hd, Et, Ed = n_hidden_enc, n_hidden_dec, n_embed_text, n_embed_dec

    def gru_dir(E, H):
        wih = nrm(next(ks), (3, E, H))            # gates r, z, n
        whh = nrm(next(ks), (3, H, H))
        bih = nrm(next(ks), (3, 1, H))
        bhh = nrm(next(ks), (3, 1, H))
        brz = bih[0:2] + bhh[0:2]                 # pre-combined r/z biases
        bn = jnp.stack([bih[2], bhh[2]])          # (bih_n, bhh_n) kept separate
        return wih, whh, brz, bn

    wih_f, whh_f, brz_f, bn_f = gru_dir(Et, He)
    wih_b, whh_b, brz_b, bn_b = gru_dir(Et, He)

    p = {
        "enc_emb": nrm(next(ks), (n_vocab, Et)),
        "enc_wih_f": wih_f, "enc_whh_f": whh_f, "enc_brz_f": brz_f, "enc_bn_f": bn_f,
        "enc_wih_b": wih_b, "enc_whh_b": whh_b, "enc_brz_b": brz_b, "enc_bn_b": bn_b,
        "enc_fc_wf": nrm(next(ks), (He, Hd)),
        "enc_fc_wb": nrm(next(ks), (He, Hd)),
        "enc_fc_b": nrm(next(ks), (1, Hd)),
        "att_wah": nrm(next(ks), (Hd, Hd)),
        "att_wae_f": nrm(next(ks), (He, Hd)),
        "att_wae_b": nrm(next(ks), (He, Hd)),
        "att_ba": nrm(next(ks), (1, Hd)),
        "att_v": nrm(next(ks), (1, Hd)),
        "dec_emb": nrm(next(ks), (n_output, Ed)),
        # decoder GRU: input is [emb ; ctx] -> split weights per part, per gate
        "dec_we": nrm(next(ks), (3, Ed, Hd)),
        "dec_wc": nrm(next(ks), (3, 2 * He, Hd)),
        "dec_whh": nrm(next(ks), (3, Hd, Hd)),
    }
    dbih = nrm(next(ks), (3, 1, Hd))
    dbhh = nrm(next(ks), (3, 1, Hd))
    p["dec_brz"] = dbih[0:2] + dbhh[0:2]
    p["dec_bn"] = jnp.stack([dbih[2], dbhh[2]])
    # output linear ([h ; ctx ; emb] -> n_output), split to avoid concat
    p["fc_out_wh"] = nrm(next(ks), (Hd, n_output))
    p["fc_out_wc"] = nrm(next(ks), (2 * He, n_output))
    p["fc_out_we"] = nrm(next(ks), (Ed, n_output))
    p["fc_out_b"] = nrm(next(ks), (1, n_output))
    return p


# ----------------------------------------------------------------------------
if __name__ == "__main__":
    # TODO(synk): only n_layers=1 supported; nn.Dropout is identity (eval mode).
    n_vocab = 50
    n_embed_text = 16
    n_embed_dec = 16
    n_hidden_enc = 32
    n_hidden_dec = 32
    n_output = 40
    B, src_len, trg_len = 2, 8, 8

    key = jax.random.PRNGKey(0)
    k_params, k_in, k_tg = jax.random.split(key, 3)
    params = init_params(k_params, n_vocab, n_embed_text, n_embed_dec,
                         n_hidden_enc, n_hidden_dec, n_output)
    inputs = jax.random.randint(k_in, (B, src_len), 0, n_vocab, dtype=jnp.int32)
    targets = jax.random.randint(k_tg, (B, trg_len), 0, n_output, dtype=jnp.int32)

    outputs, att_table = seq2seq_forward(params, inputs, targets,
                                         tf_ratio=0.5, tf_seed=0)
    jax.block_until_ready((outputs, att_table))

    assert outputs.shape == (B, n_output, trg_len)
    assert att_table.shape == (B, trg_len - 1, src_len)
    print("KERNEL_OK")
</pallas_src>

<mosaic_0001>
module attributes {stable_mosaic.version = 11 : i64} {
  func.func @_decoder_kernel(%arg0: memref<8x2x1xf32, #tpu.memory_space<vmem>>, %arg1: memref<8x1x1xf32, #tpu.memory_space<vmem>>, %arg2: memref<2x8x64xf32, #tpu.memory_space<vmem>>, %arg3: memref<2x8x32xf32, #tpu.memory_space<vmem>>, %arg4: memref<2x32xf32, #tpu.memory_space<vmem>>, %arg5: memref<40x16xf32, #tpu.memory_space<vmem>>, %arg6: memref<32x32xf32, #tpu.memory_space<vmem>>, %arg7: memref<1x32xf32, #tpu.memory_space<vmem>>, %arg8: memref<3x16x32xf32, #tpu.memory_space<vmem>>, %arg9: memref<3x64x32xf32, #tpu.memory_space<vmem>>, %arg10: memref<3x32x32xf32, #tpu.memory_space<vmem>>, %arg11: memref<2x1x32xf32, #tpu.memory_space<vmem>>, %arg12: memref<2x1x32xf32, #tpu.memory_space<vmem>>, %arg13: memref<32x40xf32, #tpu.memory_space<vmem>>, %arg14: memref<64x40xf32, #tpu.memory_space<vmem>>, %arg15: memref<16x40xf32, #tpu.memory_space<vmem>>, %arg16: memref<1x40xf32, #tpu.memory_space<vmem>>, %arg17: memref<8x2x40xf32, #tpu.memory_space<vmem>>, %arg18: memref<7x2x8xf32, #tpu.memory_space<vmem>>) attributes {dimension_semantics = [], scalar_prefetch = 0 : i64, scratch_operands = 0 : i64, tpu.core_type = #tpu.core_type<tc>} {
    %c0 = arith.constant 0 : index
    %c0_0 = arith.constant 0 : index
    %c0_1 = arith.constant 0 : index
    %0 = vector.load %arg2[%c0, %c0_0, %c0_1] : memref<2x8x64xf32, #tpu.memory_space<vmem>>, vector<2x8x64xf32>
    %c0_2 = arith.constant 0 : index
    %c0_3 = arith.constant 0 : index
    %c0_4 = arith.constant 0 : index
    %1 = vector.load %arg3[%c0_2, %c0_3, %c0_4] : memref<2x8x32xf32, #tpu.memory_space<vmem>>, vector<2x8x32xf32>
    %c0_5 = arith.constant 0 : index
    %c0_6 = arith.constant 0 : index
    %2 = vector.load %arg5[%c0_5, %c0_6] : memref<40x16xf32, #tpu.memory_space<vmem>>, vector<40x16xf32>
    %c0_7 = arith.constant 0 : index
    %c0_8 = arith.constant 0 : index
    %3 = vector.load %arg6[%c0_7, %c0_8] : memref<32x32xf32, #tpu.memory_space<vmem>>, vector<32x32xf32>
    %c0_9 = arith.constant 0 : index
    %c0_10 = arith.constant 0 : index
    %4 = vector.load %arg7[%c0_9, %c0_10] : memref<1x32xf32, #tpu.memory_space<vmem>>, vector<1x32xf32>
    %c0_11 = arith.constant 0 : index
    %c0_12 = arith.constant 0 : index
    %c0_13 = arith.constant 0 : index
    %5 = vector.load %arg11[%c0_11, %c0_12, %c0_13] : memref<2x1x32xf32, #tpu.memory_space<vmem>>, vector<1x1x32xf32>
    %6 = vector.shape_cast %5 : vector<1x1x32xf32> to vector<1x32xf32>
    %c1 = arith.constant 1 : index
    %c0_14 = arith.constant 0 : index
    %c0_15 = arith.constant 0 : index
    %7 = vector.load %arg11[%c1, %c0_14, %c0_15] : memref<2x1x32xf32, #tpu.memory_space<vmem>>, vector<1x1x32xf32>
    %8 = vector.shape_cast %7 : vector<1x1x32xf32> to vector<1x32xf32>
    %c0_16 = arith.constant 0 : index
    %c0_17 = arith.constant 0 : index
    %c0_18 = arith.constant 0 : index
    %9 = vector.load %arg12[%c0_16, %c0_17, %c0_18] : memref<2x1x32xf32, #tpu.memory_space<vmem>>, vector<1x1x32xf32>
    %10 = vector.shape_cast %9 : vector<1x1x32xf32> to vector<1x32xf32>
    %c1_19 = arith.constant 1 : index
    %c0_20 = arith.constant 0 : index
    %c0_21 = arith.constant 0 : index
    %11 = vector.load %arg12[%c1_19, %c0_20, %c0_21] : memref<2x1x32xf32, #tpu.memory_space<vmem>>, vector<1x1x32xf32>
    %12 = vector.shape_cast %11 : vector<1x1x32xf32> to vector<1x32xf32>
    %c0_22 = arith.constant 0 : index
    %c0_23 = arith.constant 0 : index
    %13 = vector.load %arg16[%c0_22, %c0_23] : memref<1x40xf32, #tpu.memory_space<vmem>>, vector<1x40xf32>
    %14 = tpu.iota {dimensions = array<i32: 1>} : vector<2x40xi32>
    %15 = arith.sitofp %14 : vector<2x40xi32> to vector<2x40xf32>
    %cst = arith.constant 0.000000e+00 : f32
    %16 = vector.broadcast %cst : f32 to vector<2x40xf32>
    %c0_24 = arith.constant 0 : index
    %c0_25 = arith.constant 0 : index
    %c0_26 = arith.constant 0 : index
    %17 = vector.load %arg17[%c0_24, %c0_25, %c0_26] : memref<8x2x40xf32, #tpu.memory_space<vmem>>, vector<1x2x40xf32>
    %18 = vector.shape_cast %17 : vector<1x2x40xf32> to vector<2x40xf32>
    %19 = vector.shape_cast %16 : vector<2x40xf32> to vector<1x2x40xf32>
    tpu.vector_store %arg17[%c0_24, %c0_25, %c0_26], %19 {strides = array<i32>} : memref<8x2x40xf32, #tpu.memory_space<vmem>>, vector<1x2x40xf32>,
    %c0_27 = arith.constant 0 : index
    %c0_28 = arith.constant 0 : index
    %20 = vector.load %arg4[%c0_27, %c0_28] : memref<2x32xf32, #tpu.memory_space<vmem>>, vector<2x32xf32>
    %c0_29 = arith.constant 0 : index
    %c0_30 = arith.constant 0 : index
    %c0_31 = arith.constant 0 : index
    %21 = vector.load %arg0[%c0_29, %c0_30, %c0_31] : memref<8x2x1xf32, #tpu.memory_space<vmem>>, vector<1x2x1xf32>
    %22 = vector.shape_cast %21 : vector<1x2x1xf32> to vector<2x1xf32>
    %c1_i32 = arith.constant 1 : i32
    %c7_i32 = arith.constant 7 : i32
    %23 = arith.addi %c1_i32, %c7_i32 : i32
    %c1_i32_32 = arith.constant 1 : i32
    %24:2 = scf.for %arg19 = %c1_i32 to %23 step %c1_i32_32 iter_args(%arg20 = %20, %arg21 = %22) -> (vector<2x32xf32>, vector<2x1xf32>)  : i32 {
      %25 = vector.broadcast %arg21 : vector<2x1xf32> to vector<2x40xf32>
      %26 = arith.cmpf oeq, %25, %15 : vector<2x40xf32>
      %27 = arith.extui %26 : vector<2x40xi1> to vector<2x40xi32>
      %28 = arith.sitofp %27 : vector<2x40xi32> to vector<2x40xf32>
      %cst_34 = arith.constant dense<0.000000e+00> : vector<2x16xf32>
      %29 = tpu.matmul %28, %2, %cst_34 {dimension_numbers = #tpu.dot_dimension_numbers<[1], [0], [0], [1], [0, 0, 1, 1], [], []>} : vector<2x40xf32>, vector<40x16xf32>, vector<2x16xf32> -> vector<2x16xf32>
      %cst_35 = arith.constant dense<0.000000e+00> : vector<2x32xf32>
      %30 = tpu.matmul %arg20, %3, %cst_35 {dimension_numbers = #tpu.dot_dimension_numbers<[1], [0], [0], [1], [0, 0, 1, 1], [], []>} : vector<2x32xf32>, vector<32x32xf32>, vector<2x32xf32> -> vector<2x32xf32>
      %31 = vector.shape_cast %30 : vector<2x32xf32> to vector<2x1x32xf32>
      %32 = vector.broadcast %31 : vector<2x1x32xf32> to vector<2x8x32xf32>
      %33 = arith.addf %32, %1 : vector<2x8x32xf32>
      %34 = math.tanh %33 : vector<2x8x32xf32>
      %35 = vector.shape_cast %4 : vector<1x32xf32> to vector<1x1x32xf32>
      %36 = vector.broadcast %35 : vector<1x1x32xf32> to vector<2x8x32xf32>
      %37 = arith.mulf %34, %36 : vector<2x8x32xf32>
      %cst_36 = arith.constant dense<0.000000e+00> : vector<2x8xf32>
      %38 = vector.multi_reduction <add>, %37, %cst_36 [2] : vector<2x8x32xf32> to vector<2x8xf32>
      %cst_37 = arith.constant dense<0xFF800000> : vector<2xf32>
      %39 = vector.multi_reduction <maximumf>, %38, %cst_37 [1] : vector<2x8xf32> to vector<2xf32>
      %40 = vector.shape_cast %39 : vector<2xf32> to vector<2x1xf32>
      %41 = vector.broadcast %40 : vector<2x1xf32> to vector<2x8xf32>
      %42 = arith.subf %38, %41 : vector<2x8xf32>
      %43 = math.exp %42 : vector<2x8xf32>
      %cst_38 = arith.constant dense<0.000000e+00> : vector<2xf32>
      %44 = vector.multi_reduction <add>, %43, %cst_38 [1] : vector<2x8xf32> to vector<2xf32>
      %45 = vector.shape_cast %44 : vector<2xf32> to vector<2x1xf32>
      %46 = vector.broadcast %45 : vector<2x1xf32> to vector<2x8xf32>
      %47 = arith.divf %43, %46 : vector<2x8xf32>
      %48 = vector.shape_cast %47 : vector<2x8xf32> to vector<2x8x1xf32>
      %49 = vector.broadcast %48 : vector<2x8x1xf32> to vector<2x8x64xf32>
      %50 = arith.mulf %49, %0 : vector<2x8x64xf32>
      %cst_39 = arith.constant dense<0.000000e+00> : vector<2x64xf32>
      %51 = vector.multi_reduction <add>, %50, %cst_39 [1] : vector<2x8x64xf32> to vector<2x64xf32>
      %c0_40 = arith.constant 0 : index
      %c0_41 = arith.constant 0 : index
      %c0_42 = arith.constant 0 : index
      %52 = vector.load %arg8[%c0_40, %c0_41, %c0_42] : memref<3x16x32xf32, #tpu.memory_space<vmem>>, vector<1x16x32xf32>
      %53 = vector.shape_cast %52 : vector<1x16x32xf32> to vector<16x32xf32>
      %cst_43 = arith.constant dense<0.000000e+00> : vector<2x32xf32>
      %54 = tpu.matmul %29, %53, %cst_43 {dimension_numbers = #tpu.dot_dimension_numbers<[1], [0], [0], [1], [0, 0, 1, 1], [], []>} : vector<2x16xf32>, vector<16x32xf32>, vector<2x32xf32> -> vector<2x32xf32>
      %c0_44 = arith.constant 0 : index
      %c0_45 = arith.constant 0 : index
      %c0_46 = arith.constant 0 : index
      %55 = vector.load %arg9[%c0_44, %c0_45, %c0_46] : memref<3x64x32xf32, #tpu.memory_space<vmem>>, vector<1x64x32xf32>
      %56 = vector.shape_cast %55 : vector<1x64x32xf32> to vector<64x32xf32>
      %cst_47 = arith.constant dense<0.000000e+00> : vector<2x32xf32>
      %57 = tpu.matmul %51, %56, %cst_47 {dimension_numbers = #tpu.dot_dimension_numbers<[1], [0], [0], [1], [0, 0, 1, 1], [], []>} : vector<2x64xf32>, vector<64x32xf32>, vector<2x32xf32> -> vector<2x32xf32>
      %58 = arith.addf %54, %57 : vector<2x32xf32>
      %c0_48 = arith.constant 0 : index
      %c0_49 = arith.constant 0 : index
      %c0_50 = arith.constant 0 : index
      %59 = vector.load %arg10[%c0_48, %c0_49, %c0_50] : memref<3x32x32xf32, #tpu.memory_space<vmem>>, vector<1x32x32xf32>
      %60 = vector.shape_cast %59 : vector<1x32x32xf32> to vector<32x32xf32>
      %cst_51 = arith.constant dense<0.000000e+00> : vector<2x32xf32>
      %61 = tpu.matmul %arg20, %60, %cst_51 {dimension_numbers = #tpu.dot_dimension_numbers<[1], [0], [0], [1], [0, 0, 1, 1], [], []>} : vector<2x32xf32>, vector<32x32xf32>, vector<2x32xf32> -> vector<2x32xf32>
      %62 = arith.addf %58, %61 : vector<2x32xf32>
      %63 = vector.broadcast %6 : vector<1x32xf32> to vector<2x32xf32>
      %64 = arith.addf %62, %63 : vector<2x32xf32>
      %65 = arith.negf %64 : vector<2x32xf32>
      %66 = math.exp %65 : vector<2x32xf32>
      %cst_52 = arith.constant 1.000000e+00 : f32
      %67 = vector.broadcast %cst_52 : f32 to vector<2x32xf32>
      %68 = arith.addf %67, %66 : vector<2x32xf32>
      %69 = arith.divf %67, %68 : vector<2x32xf32>
      %c1_53 = arith.constant 1 : index
      %c0_54 = arith.constant 0 : index
      %c0_55 = arith.constant 0 : index
      %70 = vector.load %arg8[%c1_53, %c0_54, %c0_55] : memref<3x16x32xf32, #tpu.memory_space<vmem>>, vector<1x16x32xf32>
      %71 = vector.shape_cast %70 : vector<1x16x32xf32> to vector<16x32xf32>
      %cst_56 = arith.constant dense<0.000000e+00> : vector<2x32xf32>
      %72 = tpu.matmul %29, %71, %cst_56 {dimension_numbers = #tpu.dot_dimension_numbers<[1], [0], [0], [1], [0, 0, 1, 1], [], []>} : vector<2x16xf32>, vector<16x32xf32>, vector<2x32xf32> -> vector<2x32xf32>
      %c1_57 = arith.constant 1 : index
      %c0_58 = arith.constant 0 : index
      %c0_59 = arith.constant 0 : index
      %73 = vector.load %arg9[%c1_57, %c0_58, %c0_59] : memref<3x64x32xf32, #tpu.memory_space<vmem>>, vector<1x64x32xf32>
      %74 = vector.shape_cast %73 : vector<1x64x32xf32> to vector<64x32xf32>
      %cst_60 = arith.constant dense<0.000000e+00> : vector<2x32xf32>
      %75 = tpu.matmul %51, %74, %cst_60 {dimension_numbers = #tpu.dot_dimension_numbers<[1], [0], [0], [1], [0, 0, 1, 1], [], []>} : vector<2x64xf32>, vector<64x32xf32>, vector<2x32xf32> -> vector<2x32xf32>
      %76 = arith.addf %72, %75 : vector<2x32xf32>
      %c1_61 = arith.constant 1 : index
      %c0_62 = arith.constant 0 : index
      %c0_63 = arith.constant 0 : index
      %77 = vector.load %arg10[%c1_61, %c0_62, %c0_63] : memref<3x32x32xf32, #tpu.memory_space<vmem>>, vector<1x32x32xf32>
      %78 = vector.shape_cast %77 : vector<1x32x32xf32> to vector<32x32xf32>
      %cst_64 = arith.constant dense<0.000000e+00> : vector<2x32xf32>
      %79 = tpu.matmul %arg20, %78, %cst_64 {dimension_numbers = #tpu.dot_dimension_numbers<[1], [0], [0], [1], [0, 0, 1, 1], [], []>} : vector<2x32xf32>, vector<32x32xf32>, vector<2x32xf32> -> vector<2x32xf32>
      %80 = arith.addf %76, %79 : vector<2x32xf32>
      %81 = vector.broadcast %8 : vector<1x32xf32> to vector<2x32xf32>
      %82 = arith.addf %80, %81 : vector<2x32xf32>
      %83 = arith.negf %82 : vector<2x32xf32>
      %84 = math.exp %83 : vector<2x32xf32>
      %cst_65 = arith.constant 1.000000e+00 : f32
      %85 = vector.broadcast %cst_65 : f32 to vector<2x32xf32>
      %86 = arith.addf %85, %84 : vector<2x32xf32>
      %87 = arith.divf %85, %86 : vector<2x32xf32>
      %c2 = arith.constant 2 : index
      %c0_66 = arith.constant 0 : index
      %c0_67 = arith.constant 0 : index
      %88 = vector.load %arg8[%c2, %c0_66, %c0_67] : memref<3x16x32xf32, #tpu.memory_space<vmem>>, vector<1x16x32xf32>
      %89 = vector.shape_cast %88 : vector<1x16x32xf32> to vector<16x32xf32>
      %cst_68 = arith.constant dense<0.000000e+00> : vector<2x32xf32>
      %90 = tpu.matmul %29, %89, %cst_68 {dimension_numbers = #tpu.dot_dimension_numbers<[1], [0], [0], [1], [0, 0, 1, 1], [], []>} : vector<2x16xf32>, vector<16x32xf32>, vector<2x32xf32> -> vector<2x32xf32>
      %c2_69 = arith.constant 2 : index
      %c0_70 = arith.constant 0 : index
      %c0_71 = arith.constant 0 : index
      %91 = vector.load %arg9[%c2_69, %c0_70, %c0_71] : memref<3x64x32xf32, #tpu.memory_space<vmem>>, vector<1x64x32xf32>
      %92 = vector.shape_cast %91 : vector<1x64x32xf32> to vector<64x32xf32>
      %cst_72 = arith.constant dense<0.000000e+00> : vector<2x32xf32>
      %93 = tpu.matmul %51, %92, %cst_72 {dimension_numbers = #tpu.dot_dimension_numbers<[1], [0], [0], [1], [0, 0, 1, 1], [], []>} : vector<2x64xf32>, vector<64x32xf32>, vector<2x32xf32> -> vector<2x32xf32>
      %94 = arith.addf %90, %93 : vector<2x32xf32>
      %95 = vector.broadcast %10 : vector<1x32xf32> to vector<2x32xf32>
      %96 = arith.addf %94, %95 : vector<2x32xf32>
      %c2_73 = arith.constant 2 : index
      %c0_74 = arith.constant 0 : index
      %c0_75 = arith.constant 0 : index
      %97 = vector.load %arg10[%c2_73, %c0_74, %c0_75] : memref<3x32x32xf32, #tpu.memory_space<vmem>>, vector<1x32x32xf32>
      %98 = vector.shape_cast %97 : vector<1x32x32xf32> to vector<32x32xf32>
      %cst_76 = arith.constant dense<0.000000e+00> : vector<2x32xf32>
      %99 = tpu.matmul %arg20, %98, %cst_76 {dimension_numbers = #tpu.dot_dimension_numbers<[1], [0], [0], [1], [0, 0, 1, 1], [], []>} : vector<2x32xf32>, vector<32x32xf32>, vector<2x32xf32> -> vector<2x32xf32>
      %100 = vector.broadcast %12 : vector<1x32xf32> to vector<2x32xf32>
      %101 = arith.addf %99, %100 : vector<2x32xf32>
      %102 = arith.mulf %69, %101 : vector<2x32xf32>
      %103 = arith.addf %96, %102 : vector<2x32xf32>
      %104 = math.tanh %103 : vector<2x32xf32>
      %cst_77 = arith.constant 1.000000e+00 : f32
      %105 = vector.broadcast %cst_77 : f32 to vector<2x32xf32>
      %106 = arith.subf %105, %87 : vector<2x32xf32>
      %107 = arith.mulf %106, %104 : vector<2x32xf32>
      %108 = arith.mulf %87, %arg20 : vector<2x32xf32>
      %109 = arith.addf %107, %108 : vector<2x32xf32>
      %c0_78 = arith.constant 0 : index
      %c0_79 = arith.constant 0 : index
      %110 = vector.load %arg13[%c0_78, %c0_79] : memref<32x40xf32, #tpu.memory_space<vmem>>, vector<32x40xf32>
      %cst_80 = arith.constant dense<0.000000e+00> : vector<2x40xf32>
      %111 = tpu.matmul %109, %110, %cst_80 {dimension_numbers = #tpu.dot_dimension_numbers<[1], [0], [0], [1], [0, 0, 1, 1], [], []>} : vector<2x32xf32>, vector<32x40xf32>, vector<2x40xf32> -> vector<2x40xf32>
      %c0_81 = arith.constant 0 : index
      %c0_82 = arith.constant 0 : index
      %112 = vector.load %arg14[%c0_81, %c0_82] : memref<64x40xf32, #tpu.memory_space<vmem>>, vector<64x40xf32>
      %cst_83 = arith.constant dense<0.000000e+00> : vector<2x40xf32>
      %113 = tpu.matmul %51, %112, %cst_83 {dimension_numbers = #tpu.dot_dimension_numbers<[1], [0], [0], [1], [0, 0, 1, 1], [], []>} : vector<2x64xf32>, vector<64x40xf32>, vector<2x40xf32> -> vector<2x40xf32>
      %114 = arith.addf %111, %113 : vector<2x40xf32>
      %c0_84 = arith.constant 0 : index
      %c0_85 = arith.constant 0 : index
      %115 = vector.load %arg15[%c0_84, %c0_85] : memref<16x40xf32, #tpu.memory_space<vmem>>, vector<16x40xf32>
      %cst_86 = arith.constant dense<0.000000e+00> : vector<2x40xf32>
      %116 = tpu.matmul %29, %115, %cst_86 {dimension_numbers = #tpu.dot_dimension_numbers<[1], [0], [0], [1], [0, 0, 1, 1], [], []>} : vector<2x16xf32>, vector<16x40xf32>, vector<2x40xf32> -> vector<2x40xf32>
      %117 = arith.addf %114, %116 : vector<2x40xf32>
      %118 = vector.broadcast %13 : vector<1x40xf32> to vector<2x40xf32>
      %119 = arith.addf %117, %118 : vector<2x40xf32>
      %120 = arith.index_cast %arg19 : i32 to index
      %c0_87 = arith.constant 0 : index
      %c0_88 = arith.constant 0 : index
      %121 = vector.load %arg17[%120, %c0_87, %c0_88] : memref<8x2x40xf32, #tpu.memory_space<vmem>>, vector<1x2x40xf32>
      %122 = vector.shape_cast %121 : vector<1x2x40xf32> to vector<2x40xf32>
      %123 = vector.shape_cast %119 : vector<2x40xf32> to vector<1x2x40xf32>
      tpu.vector_store %arg17[%120, %c0_87, %c0_88], %123 {strides = array<i32>} : memref<8x2x40xf32, #tpu.memory_space<vmem>>, vector<1x2x40xf32>,
      %c1_i32_89 = arith.constant 1 : i32
      %124 = arith.subi %arg19, %c1_i32_89 : i32
      %125 = arith.index_cast %124 : i32 to index
      %c0_90 = arith.constant 0 : index
      %c0_91 = arith.constant 0 : index
      %126 = vector.load %arg18[%125, %c0_90, %c0_91] : memref<7x2x8xf32, #tpu.memory_space<vmem>>, vector<1x2x8xf32>
      %127 = vector.shape_cast %126 : vector<1x2x8xf32> to vector<2x8xf32>
      %128 = vector.shape_cast %47 : vector<2x8xf32> to vector<1x2x8xf32>
      tpu.vector_store %arg18[%125, %c0_90, %c0_91], %128 {strides = array<i32>} : memref<7x2x8xf32, #tpu.memory_space<vmem>>, vector<1x2x8xf32>,
      %cst_92 = arith.constant dense<0xFF800000> : vector<2xf32>
      %129 = vector.multi_reduction <maximumf>, %119, %cst_92 [1] : vector<2x40xf32> to vector<2xf32>
      %130 = vector.shape_cast %129 : vector<2xf32> to vector<2x1xf32>
      %131 = vector.broadcast %130 : vector<2x1xf32> to vector<2x40xf32>
      %132 = arith.cmpf oeq, %119, %131 : vector<2x40xf32>
      %cst_93 = arith.constant 4.000000e+01 : f32
      %133 = vector.broadcast %cst_93 : f32 to vector<2x40xf32>
      %134 = arith.select %132, %15, %133 : vector<2x40xi1>, vector<2x40xf32>
      %cst_94 = arith.constant dense<0x7F800000> : vector<2xf32>
      %135 = vector.multi_reduction <minimumf>, %134, %cst_94 [1] : vector<2x40xf32> to vector<2xf32>
      %136 = vector.shape_cast %135 : vector<2xf32> to vector<2x1xf32>
      %137 = arith.index_cast %arg19 : i32 to index
      %c0_95 = arith.constant 0 : index
      %c0_96 = arith.constant 0 : index
      %138 = vector.load %arg1[%137, %c0_95, %c0_96] : memref<8x1x1xf32, #tpu.memory_space<vmem>>, vector<1x1x1xf32>
      %139 = vector.shape_cast %138 : vector<1x1x1xf32> to vector<1x1xf32>
      %cst_97 = arith.constant 5.000000e-01 : f32
      %140 = vector.broadcast %cst_97 : f32 to vector<1x1xf32>
      %141 = arith.cmpf ogt, %139, %140 : vector<1x1xf32>
      %142 = arith.index_cast %arg19 : i32 to index
      %c0_98 = arith.constant 0 : index
      %c0_99 = arith.constant 0 : index
      %143 = vector.load %arg0[%142, %c0_98, %c0_99] : memref<8x2x1xf32, #tpu.memory_space<vmem>>, vector<1x2x1xf32>
      %144 = vector.shape_cast %143 : vector<1x2x1xf32> to vector<2x1xf32>
      %145 = vector.shape_cast %141 : vector<1x1xi1> to vector<1x1xi1>
      %146 = vector.broadcast %145 : vector<1x1xi1> to vector<2x1xi1>
      %147 = arith.select %146, %144, %136 : vector<2x1xi1>, vector<2x1xf32>
      scf.yield %109, %147 : vector<2x32xf32>, vector<2x1xf32>
    }
    %c7_i32_33 = arith.constant 7 : i32
    return
  }
}

module attributes {stable_mosaic.version = 11 : i64} {
  func.func @_encoder_kernel(%arg0: memref<8x2x16xf32, #tpu.memory_space<vmem>>, %arg1: memref<3x16x32xf32, #tpu.memory_space<vmem>>, %arg2: memref<3x32x32xf32, #tpu.memory_space<vmem>>, %arg3: memref<2x1x32xf32, #tpu.memory_space<vmem>>, %arg4: memref<2x1x32xf32, #tpu.memory_space<vmem>>, %arg5: memref<3x16x32xf32, #tpu.memory_space<vmem>>, %arg6: memref<3x32x32xf32, #tpu.memory_space<vmem>>, %arg7: memref<2x1x32xf32, #tpu.memory_space<vmem>>, %arg8: memref<2x1x32xf32, #tpu.memory_space<vmem>>, %arg9: memref<32x32xf32, #tpu.memory_space<vmem>>, %arg10: memref<32x32xf32, #tpu.memory_space<vmem>>, %arg11: memref<1x32xf32, #tpu.memory_space<vmem>>, %arg12: memref<32x32xf32, #tpu.memory_space<vmem>>, %arg13: memref<32x32xf32, #tpu.memory_space<vmem>>, %arg14: memref<1x32xf32, #tpu.memory_space<vmem>>, %arg15: memref<8x2x64xf32, #tpu.memory_space<vmem>>, %arg16: memref<8x2x32xf32, #tpu.memory_space<vmem>>, %arg17: memref<2x32xf32, #tpu.memory_space<vmem>>, %arg18: memref<8x2x32xf32, #tpu.memory_space<vmem>>, %arg19: memref<8x2x32xf32, #tpu.memory_space<vmem>>) attributes {dimension_semantics = [], scalar_prefetch = 0 : i64, scratch_operands = 2 : i64, tpu.core_type = #tpu.core_type<tc>} {
    %c0 = arith.constant 0 : index
    %c0_0 = arith.constant 0 : index
    %c0_1 = arith.constant 0 : index
    %0 = vector.load %arg3[%c0, %c0_0, %c0_1] : memref<2x1x32xf32, #tpu.memory_space<vmem>>, vector<1x1x32xf32>
    %1 = vector.shape_cast %0 : vector<1x1x32xf32> to vector<1x32xf32>
    %c1 = arith.constant 1 : index
    %c0_2 = arith.constant 0 : index
    %c0_3 = arith.constant 0 : index
    %2 = vector.load %arg3[%c1, %c0_2, %c0_3] : memref<2x1x32xf32, #tpu.memory_space<vmem>>, vector<1x1x32xf32>
    %3 = vector.shape_cast %2 : vector<1x1x32xf32> to vector<1x32xf32>
    %c0_4 = arith.constant 0 : index
    %c0_5 = arith.constant 0 : index
    %c0_6 = arith.constant 0 : index
    %4 = vector.load %arg4[%c0_4, %c0_5, %c0_6] : memref<2x1x32xf32, #tpu.memory_space<vmem>>, vector<1x1x32xf32>
    %5 = vector.shape_cast %4 : vector<1x1x32xf32> to vector<1x32xf32>
    %c1_7 = arith.constant 1 : index
    %c0_8 = arith.constant 0 : index
    %c0_9 = arith.constant 0 : index
    %6 = vector.load %arg4[%c1_7, %c0_8, %c0_9] : memref<2x1x32xf32, #tpu.memory_space<vmem>>, vector<1x1x32xf32>
    %7 = vector.shape_cast %6 : vector<1x1x32xf32> to vector<1x32xf32>
    %c0_10 = arith.constant 0 : index
    %c0_11 = arith.constant 0 : index
    %c0_12 = arith.constant 0 : index
    %8 = vector.load %arg7[%c0_10, %c0_11, %c0_12] : memref<2x1x32xf32, #tpu.memory_space<vmem>>, vector<1x1x32xf32>
    %9 = vector.shape_cast %8 : vector<1x1x32xf32> to vector<1x32xf32>
    %c1_13 = arith.constant 1 : index
    %c0_14 = arith.constant 0 : index
    %c0_15 = arith.constant 0 : index
    %10 = vector.load %arg7[%c1_13, %c0_14, %c0_15] : memref<2x1x32xf32, #tpu.memory_space<vmem>>, vector<1x1x32xf32>
    %11 = vector.shape_cast %10 : vector<1x1x32xf32> to vector<1x32xf32>
    %c0_16 = arith.constant 0 : index
    %c0_17 = arith.constant 0 : index
    %c0_18 = arith.constant 0 : index
    %12 = vector.load %arg8[%c0_16, %c0_17, %c0_18] : memref<2x1x32xf32, #tpu.memory_space<vmem>>, vector<1x1x32xf32>
    %13 = vector.shape_cast %12 : vector<1x1x32xf32> to vector<1x32xf32>
    %c1_19 = arith.constant 1 : index
    %c0_20 = arith.constant 0 : index
    %c0_21 = arith.constant 0 : index
    %14 = vector.load %arg8[%c1_19, %c0_20, %c0_21] : memref<2x1x32xf32, #tpu.memory_space<vmem>>, vector<1x1x32xf32>
    %15 = vector.shape_cast %14 : vector<1x1x32xf32> to vector<1x32xf32>
    %cst = arith.constant 0.000000e+00 : f32
    %16 = vector.broadcast %cst : f32 to vector<2x32xf32>
    %c0_i32 = arith.constant 0 : i32
    %c8_i32 = arith.constant 8 : i32
    %17 = arith.addi %c0_i32, %c8_i32 : i32
    %c1_i32 = arith.constant 1 : i32
    %18:2 = scf.for %arg20 = %c0_i32 to %17 step %c1_i32 iter_args(%arg21 = %16, %arg22 = %16) -> (vector<2x32xf32>, vector<2x32xf32>)  : i32 {
      %45 = arith.index_cast %arg20 : i32 to index
      %c0_55 = arith.constant 0 : index
      %c0_56 = arith.constant 0 : index
      %46 = vector.load %arg0[%45, %c0_55, %c0_56] : memref<8x2x16xf32, #tpu.memory_space<vmem>>, vector<1x2x16xf32>
      %47 = vector.shape_cast %46 : vector<1x2x16xf32> to vector<2x16xf32>
      %c0_57 = arith.constant 0 : index
      %c0_58 = arith.constant 0 : index
      %c0_59 = arith.constant 0 : index
      %48 = vector.load %arg1[%c0_57, %c0_58, %c0_59] : memref<3x16x32xf32, #tpu.memory_space<vmem>>, vector<1x16x32xf32>
      %49 = vector.shape_cast %48 : vector<1x16x32xf32> to vector<16x32xf32>
      %cst_60 = arith.constant dense<0.000000e+00> : vector<2x32xf32>
      %50 = tpu.matmul %47, %49, %cst_60 {dimension_numbers = #tpu.dot_dimension_numbers<[1], [0], [0], [1], [0, 0, 1, 1], [], []>} : vector<2x16xf32>, vector<16x32xf32>, vector<2x32xf32> -> vector<2x32xf32>
      %c0_61 = arith.constant 0 : index
      %c0_62 = arith.constant 0 : index
      %c0_63 = arith.constant 0 : index
      %51 = vector.load %arg2[%c0_61, %c0_62, %c0_63] : memref<3x32x32xf32, #tpu.memory_space<vmem>>, vector<1x32x32xf32>
      %52 = vector.shape_cast %51 : vector<1x32x32xf32> to vector<32x32xf32>
      %cst_64 = arith.constant dense<0.000000e+00> : vector<2x32xf32>
      %53 = tpu.matmul %arg21, %52, %cst_64 {dimension_numbers = #tpu.dot_dimension_numbers<[1], [0], [0], [1], [0, 0, 1, 1], [], []>} : vector<2x32xf32>, vector<32x32xf32>, vector<2x32xf32> -> vector<2x32xf32>
      %54 = arith.addf %50, %53 : vector<2x32xf32>
      %55 = vector.broadcast %1 : vector<1x32xf32> to vector<2x32xf32>
      %56 = arith.addf %54, %55 : vector<2x32xf32>
      %57 = arith.negf %56 : vector<2x32xf32>
      %58 = math.exp %57 : vector<2x32xf32>
      %cst_65 = arith.constant 1.000000e+00 : f32
      %59 = vector.broadcast %cst_65 : f32 to vector<2x32xf32>
      %60 = arith.addf %59, %58 : vector<2x32xf32>
      %61 = arith.divf %59, %60 : vector<2x32xf32>
      %c1_66 = arith.constant 1 : index
      %c0_67 = arith.constant 0 : index
      %c0_68 = arith.constant 0 : index
      %62 = vector.load %arg1[%c1_66, %c0_67, %c0_68] : memref<3x16x32xf32, #tpu.memory_space<vmem>>, vector<1x16x32xf32>
      %63 = vector.shape_cast %62 : vector<1x16x32xf32> to vector<16x32xf32>
      %cst_69 = arith.constant dense<0.000000e+00> : vector<2x32xf32>
      %64 = tpu.matmul %47, %63, %cst_69 {dimension_numbers = #tpu.dot_dimension_numbers<[1], [0], [0], [1], [0, 0, 1, 1], [], []>} : vector<2x16xf32>, vector<16x32xf32>, vector<2x32xf32> -> vector<2x32xf32>
      %c1_70 = arith.constant 1 : index
      %c0_71 = arith.constant 0 : index
      %c0_72 = arith.constant 0 : index
      %65 = vector.load %arg2[%c1_70, %c0_71, %c0_72] : memref<3x32x32xf32, #tpu.memory_space<vmem>>, vector<1x32x32xf32>
      %66 = vector.shape_cast %65 : vector<1x32x32xf32> to vector<32x32xf32>
      %cst_73 = arith.constant dense<0.000000e+00> : vector<2x32xf32>
      %67 = tpu.matmul %arg21, %66, %cst_73 {dimension_numbers = #tpu.dot_dimension_numbers<[1], [0], [0], [1], [0, 0, 1, 1], [], []>} : vector<2x32xf32>, vector<32x32xf32>, vector<2x32xf32> -> vector<2x32xf32>
      %68 = arith.addf %64, %67 : vector<2x32xf32>
      %69 = vector.broadcast %3 : vector<1x32xf32> to vector<2x32xf32>
      %70 = arith.addf %68, %69 : vector<2x32xf32>
      %71 = arith.negf %70 : vector<2x32xf32>
      %72 = math.exp %71 : vector<2x32xf32>
      %cst_74 = arith.constant 1.000000e+00 : f32
      %73 = vector.broadcast %cst_74 : f32 to vector<2x32xf32>
      %74 = arith.addf %73, %72 : vector<2x32xf32>
      %75 = arith.divf %73, %74 : vector<2x32xf32>
      %c2 = arith.constant 2 : index
      %c0_75 = arith.constant 0 : index
      %c0_76 = arith.constant 0 : index
      %76 = vector.load %arg1[%c2, %c0_75, %c0_76] : memref<3x16x32xf32, #tpu.memory_space<vmem>>, vector<1x16x32xf32>
      %77 = vector.shape_cast %76 : vector<1x16x32xf32> to vector<16x32xf32>
      %cst_77 = arith.constant dense<0.000000e+00> : vector<2x32xf32>
      %78 = tpu.matmul %47, %77, %cst_77 {dimension_numbers = #tpu.dot_dimension_numbers<[1], [0], [0], [1], [0, 0, 1, 1], [], []>} : vector<2x16xf32>, vector<16x32xf32>, vector<2x32xf32> -> vector<2x32xf32>
      %79 = vector.broadcast %5 : vector<1x32xf32> to vector<2x32xf32>
      %80 = arith.addf %78, %79 : vector<2x32xf32>
      %c2_78 = arith.constant 2 : index
      %c0_79 = arith.constant 0 : index
      %c0_80 = arith.constant 0 : index
      %81 = vector.load %arg2[%c2_78, %c0_79, %c0_80] : memref<3x32x32xf32, #tpu.memory_space<vmem>>, vector<1x32x32xf32>
      %82 = vector.shape_cast %81 : vector<1x32x32xf32> to vector<32x32xf32>
      %cst_81 = arith.constant dense<0.000000e+00> : vector<2x32xf32>
      %83 = tpu.matmul %arg21, %82, %cst_81 {dimension_numbers = #tpu.dot_dimension_numbers<[1], [0], [0], [1], [0, 0, 1, 1], [], []>} : vector<2x32xf32>, vector<32x32xf32>, vector<2x32xf32> -> vector<2x32xf32>
      %84 = vector.broadcast %7 : vector<1x32xf32> to vector<2x32xf32>
      %85 = arith.addf %83, %84 : vector<2x32xf32>
      %86 = arith.mulf %61, %85 : vector<2x32xf32>
      %87 = arith.addf %80, %86 : vector<2x32xf32>
      %88 = math.tanh %87 : vector<2x32xf32>
      %cst_82 = arith.constant 1.000000e+00 : f32
      %89 = vector.broadcast %cst_82 : f32 to vector<2x32xf32>
      %90 = arith.subf %89, %75 : vector<2x32xf32>
      %91 = arith.mulf %90, %88 : vector<2x32xf32>
      %92 = arith.mulf %75, %arg21 : vector<2x32xf32>
      %93 = arith.addf %91, %92 : vector<2x32xf32>
      %c7_i32 = arith.constant 7 : i32
      %94 = arith.subi %c7_i32, %arg20 : i32
      %95 = arith.index_cast %94 : i32 to index
      %c0_83 = arith.constant 0 : index
      %c0_84 = arith.constant 0 : index
      %96 = vector.load %arg0[%95, %c0_83, %c0_84] : memref<8x2x16xf32, #tpu.memory_space<vmem>>, vector<1x2x16xf32>
      %97 = vector.shape_cast %96 : vector<1x2x16xf32> to vector<2x16xf32>
      %c0_85 = arith.constant 0 : index
      %c0_86 = arith.constant 0 : index
      %c0_87 = arith.constant 0 : index
      %98 = vector.load %arg5[%c0_85, %c0_86, %c0_87] : memref<3x16x32xf32, #tpu.memory_space<vmem>>, vector<1x16x32xf32>
      %99 = vector.shape_cast %98 : vector<1x16x32xf32> to vector<16x32xf32>
      %cst_88 = arith.constant dense<0.000000e+00> : vector<2x32xf32>
      %100 = tpu.matmul %97, %99, %cst_88 {dimension_numbers = #tpu.dot_dimension_numbers<[1], [0], [0], [1], [0, 0, 1, 1], [], []>} : vector<2x16xf32>, vector<16x32xf32>, vector<2x32xf32> -> vector<2x32xf32>
      %c0_89 = arith.constant 0 : index
      %c0_90 = arith.constant 0 : index
      %c0_91 = arith.constant 0 : index
      %101 = vector.load %arg6[%c0_89, %c0_90, %c0_91] : memref<3x32x32xf32, #tpu.memory_space<vmem>>, vector<1x32x32xf32>
      %102 = vector.shape_cast %101 : vector<1x32x32xf32> to vector<32x32xf32>
      %cst_92 = arith.constant dense<0.000000e+00> : vector<2x32xf32>
      %103 = tpu.matmul %arg22, %102, %cst_92 {dimension_numbers = #tpu.dot_dimension_numbers<[1], [0], [0], [1], [0, 0, 1, 1], [], []>} : vector<2x32xf32>, vector<32x32xf32>, vector<2x32xf32> -> vector<2x32xf32>
      %104 = arith.addf %100, %103 : vector<2x32xf32>
      %105 = vector.broadcast %9 : vector<1x32xf32> to vector<2x32xf32>
      %106 = arith.addf %104, %105 : vector<2x32xf32>
      %107 = arith.negf %106 : vector<2x32xf32>
      %108 = math.exp %107 : vector<2x32xf32>
      %cst_93 = arith.constant 1.000000e+00 : f32
      %109 = vector.broadcast %cst_93 : f32 to vector<2x32xf32>
      %110 = arith.addf %109, %108 : vector<2x32xf32>
      %111 = arith.divf %109, %110 : vector<2x32xf32>
      %c1_94 = arith.constant 1 : index
      %c0_95 = arith.constant 0 : index
      %c0_96 = arith.constant 0 : index
      %112 = vector.load %arg5[%c1_94, %c0_95, %c0_96] : memref<3x16x32xf32, #tpu.memory_space<vmem>>, vector<1x16x32xf32>
      %113 = vector.shape_cast %112 : vector<1x16x32xf32> to vector<16x32xf32>
      %cst_97 = arith.constant dense<0.000000e+00> : vector<2x32xf32>
      %114 = tpu.matmul %97, %113, %cst_97 {dimension_numbers = #tpu.dot_dimension_numbers<[1], [0], [0], [1], [0, 0, 1, 1], [], []>} : vector<2x16xf32>, vector<16x32xf32>, vector<2x32xf32> -> vector<2x32xf32>
      %c1_98 = arith.constant 1 : index
      %c0_99 = arith.constant 0 : index
      %c0_100 = arith.constant 0 : index
      %115 = vector.load %arg6[%c1_98, %c0_99, %c0_100] : memref<3x32x32xf32, #tpu.memory_space<vmem>>, vector<1x32x32xf32>
      %116 = vector.shape_cast %115 : vector<1x32x32xf32> to vector<32x32xf32>
      %cst_101 = arith.constant dense<0.000000e+00> : vector<2x32xf32>
      %117 = tpu.matmul %arg22, %116, %cst_101 {dimension_numbers = #tpu.dot_dimension_numbers<[1], [0], [0], [1], [0, 0, 1, 1], [], []>} : vector<2x32xf32>, vector<32x32xf32>, vector<2x32xf32> -> vector<2x32xf32>
      %118 = arith.addf %114, %117 : vector<2x32xf32>
      %119 = vector.broadcast %11 : vector<1x32xf32> to vector<2x32xf32>
      %120 = arith.addf %118, %119 : vector<2x32xf32>
      %121 = arith.negf %120 : vector<2x32xf32>
      %122 = math.exp %121 : vector<2x32xf32>
      %cst_102 = arith.constant 1.000000e+00 : f32
      %123 = vector.broadcast %cst_102 : f32 to vector<2x32xf32>
      %124 = arith.addf %123, %122 : vector<2x32xf32>
      %125 = arith.divf %123, %124 : vector<2x32xf32>
      %c2_103 = arith.constant 2 : index
      %c0_104 = arith.constant 0 : index
      %c0_105 = arith.constant 0 : index
      %126 = vector.load %arg5[%c2_103, %c0_104, %c0_105] : memref<3x16x32xf32, #tpu.memory_space<vmem>>, vector<1x16x32xf32>
      %127 = vector.shape_cast %126 : vector<1x16x32xf32> to vector<16x32xf32>
      %cst_106 = arith.constant dense<0.000000e+00> : vector<2x32xf32>
      %128 = tpu.matmul %97, %127, %cst_106 {dimension_numbers = #tpu.dot_dimension_numbers<[1], [0], [0], [1], [0, 0, 1, 1], [], []>} : vector<2x16xf32>, vector<16x32xf32>, vector<2x32xf32> -> vector<2x32xf32>
      %129 = vector.broadcast %13 : vector<1x32xf32> to vector<2x32xf32>
      %130 = arith.addf %128, %129 : vector<2x32xf32>
      %c2_107 = arith.constant 2 : index
      %c0_108 = arith.constant 0 : index
      %c0_109 = arith.constant 0 : index
      %131 = vector.load %arg6[%c2_107, %c0_108, %c0_109] : memref<3x32x32xf32, #tpu.memory_space<vmem>>, vector<1x32x32xf32>
      %132 = vector.shape_cast %131 : vector<1x32x32xf32> to vector<32x32xf32>
      %cst_110 = arith.constant dense<0.000000e+00> : vector<2x32xf32>
      %133 = tpu.matmul %arg22, %132, %cst_110 {dimension_numbers = #tpu.dot_dimension_numbers<[1], [0], [0], [1], [0, 0, 1, 1], [], []>} : vector<2x32xf32>, vector<32x32xf32>, vector<2x32xf32> -> vector<2x32xf32>
      %134 = vector.broadcast %15 : vector<1x32xf32> to vector<2x32xf32>
      %135 = arith.addf %133, %134 : vector<2x32xf32>
      %136 = arith.mulf %111, %135 : vector<2x32xf32>
      %137 = arith.addf %130, %136 : vector<2x32xf32>
      %138 = math.tanh %137 : vector<2x32xf32>
      %cst_111 = arith.constant 1.000000e+00 : f32
      %139 = vector.broadcast %cst_111 : f32 to vector<2x32xf32>
      %140 = arith.subf %139, %125 : vector<2x32xf32>
      %141 = arith.mulf %140, %138 : vector<2x32xf32>
      %142 = arith.mulf %125, %arg22 : vector<2x32xf32>
      %143 = arith.addf %141, %142 : vector<2x32xf32>
      %144 = arith.index_cast %arg20 : i32 to index
      %c0_112 = arith.constant 0 : index
      %c0_113 = arith.constant 0 : index
      %145 = vector.load %arg18[%144, %c0_112, %c0_113] : memref<8x2x32xf32, #tpu.memory_space<vmem>>, vector<1x2x32xf32>
      %146 = vector.shape_cast %145 : vector<1x2x32xf32> to vector<2x32xf32>
      %147 = vector.shape_cast %93 : vector<2x32xf32> to vector<1x2x32xf32>
      tpu.vector_store %arg18[%144, %c0_112, %c0_113], %147 {strides = array<i32>} : memref<8x2x32xf32, #tpu.memory_space<vmem>>, vector<1x2x32xf32>,
      %c7_i32_114 = arith.constant 7 : i32
      %148 = arith.subi %c7_i32_114, %arg20 : i32
      %149 = arith.index_cast %148 : i32 to index
      %c0_115 = arith.constant 0 : index
      %c0_116 = arith.constant 0 : index
      %150 = vector.load %arg19[%149, %c0_115, %c0_116] : memref<8x2x32xf32, #tpu.memory_space<vmem>>, vector<1x2x32xf32>
      %151 = vector.shape_cast %150 : vector<1x2x32xf32> to vector<2x32xf32>
      %152 = vector.shape_cast %143 : vector<2x32xf32> to vector<1x2x32xf32>
      tpu.vector_store %arg19[%149, %c0_115, %c0_116], %152 {strides = array<i32>} : memref<8x2x32xf32, #tpu.memory_space<vmem>>, vector<1x2x32xf32>,
      scf.yield %93, %143 : vector<2x32xf32>, vector<2x32xf32>
    }
    %c8_i32_22 = arith.constant 8 : i32
    %c0_23 = arith.constant 0 : index
    %c0_24 = arith.constant 0 : index
    %c0_25 = arith.constant 0 : index
    %19 = vector.load %arg18[%c0_23, %c0_24, %c0_25] : memref<8x2x32xf32, #tpu.memory_space<vmem>>, vector<8x2x32xf32>
    %c0_26 = arith.constant 0 : index
    %c0_27 = arith.constant 0 : index
    %c0_28 = arith.constant 0 : index
    %20 = vector.load %arg19[%c0_26, %c0_27, %c0_28] : memref<8x2x32xf32, #tpu.memory_space<vmem>>, vector<8x2x32xf32>
    %c0_29 = arith.constant 0 : index
    %c0_30 = arith.constant 0 : index
    %c0_31 = arith.constant 0 : index
    %21 = vector.load %arg15[%c0_29, %c0_30, %c0_31] : memref<8x2x64xf32, #tpu.memory_space<vmem>>, vector<8x2x32xf32>
    tpu.vector_store %arg15[%c0_29, %c0_30, %c0_31], %19 {strides = array<i32>} : memref<8x2x64xf32, #tpu.memory_space<vmem>>, vector<8x2x32xf32>,
    %c0_32 = arith.constant 0 : index
    %c0_33 = arith.constant 0 : index
    %c32 = arith.constant 32 : index
    %22 = vector.load %arg15[%c0_32, %c0_33, %c32] : memref<8x2x64xf32, #tpu.memory_space<vmem>>, vector<8x2x32xf32>
    tpu.vector_store %arg15[%c0_32, %c0_33, %c32], %20 {strides = array<i32>} : memref<8x2x64xf32, #tpu.memory_space<vmem>>, vector<8x2x32xf32>,
    %23 = vector.shape_cast %19 : vector<8x2x32xf32> to vector<16x32xf32>
    %24 = vector.shape_cast %20 : vector<8x2x32xf32> to vector<16x32xf32>
    %c0_34 = arith.constant 0 : index
    %c0_35 = arith.constant 0 : index
    %25 = vector.load %arg9[%c0_34, %c0_35] : memref<32x32xf32, #tpu.memory_space<vmem>>, vector<32x32xf32>
    %cst_36 = arith.constant dense<0.000000e+00> : vector<16x32xf32>
    %26 = tpu.matmul %23, %25, %cst_36 {dimension_numbers = #tpu.dot_dimension_numbers<[1], [0], [0], [1], [0, 0, 1, 1], [], []>} : vector<16x32xf32>, vector<32x32xf32>, vector<16x32xf32> -> vector<16x32xf32>
    %c0_37 = arith.constant 0 : index
    %c0_38 = arith.constant 0 : index
    %27 = vector.load %arg10[%c0_37, %c0_38] : memref<32x32xf32, #tpu.memory_space<vmem>>, vector<32x32xf32>
    %cst_39 = arith.constant dense<0.000000e+00> : vector<16x32xf32>
    %28 = tpu.matmul %24, %27, %cst_39 {dimension_numbers = #tpu.dot_dimension_numbers<[1], [0], [0], [1], [0, 0, 1, 1], [], []>} : vector<16x32xf32>, vector<32x32xf32>, vector<16x32xf32> -> vector<16x32xf32>
    %29 = arith.addf %26, %28 : vector<16x32xf32>
    %c0_40 = arith.constant 0 : index
    %c0_41 = arith.constant 0 : index
    %30 = vector.load %arg11[%c0_40, %c0_41] : memref<1x32xf32, #tpu.memory_space<vmem>>, vector<1x32xf32>
    %31 = vector.broadcast %30 : vector<1x32xf32> to vector<16x32xf32>
    %32 = arith.addf %29, %31 : vector<16x32xf32>
    %33 = vector.shape_cast %32 : vector<16x32xf32> to vector<8x2x32xf32>
    %c0_42 = arith.constant 0 : index
    %c0_43 = arith.constant 0 : index
    %c0_44 = arith.constant 0 : index
    %34 = vector.load %arg16[%c0_42, %c0_43, %c0_44] : memref<8x2x32xf32, #tpu.memory_space<vmem>>, vector<8x2x32xf32>
    tpu.vector_store %arg16[%c0_42, %c0_43, %c0_44], %33 {strides = array<i32>} : memref<8x2x32xf32, #tpu.memory_space<vmem>>, vector<8x2x32xf32>,
    %c0_45 = arith.constant 0 : index
    %c0_46 = arith.constant 0 : index
    %35 = vector.load %arg12[%c0_45, %c0_46] : memref<32x32xf32, #tpu.memory_space<vmem>>, vector<32x32xf32>
    %cst_47 = arith.constant dense<0.000000e+00> : vector<2x32xf32>
    %36 = tpu.matmul %18#0, %35, %cst_47 {dimension_numbers = #tpu.dot_dimension_numbers<[1], [0], [0], [1], [0, 0, 1, 1], [], []>} : vector<2x32xf32>, vector<32x32xf32>, vector<2x32xf32> -> vector<2x32xf32>
    %c0_48 = arith.constant 0 : index
    %c0_49 = arith.constant 0 : index
    %37 = vector.load %arg13[%c0_48, %c0_49] : memref<32x32xf32, #tpu.memory_space<vmem>>, vector<32x32xf32>
    %cst_50 = arith.constant dense<0.000000e+00> : vector<2x32xf32>
    %38 = tpu.matmul %18#1, %37, %cst_50 {dimension_numbers = #tpu.dot_dimension_numbers<[1], [0], [0], [1], [0, 0, 1, 1], [], []>} : vector<2x32xf32>, vector<32x32xf32>, vector<2x32xf32> -> vector<2x32xf32>
    %39 = arith.addf %36, %38 : vector<2x32xf32>
    %c0_51 = arith.constant 0 : index
    %c0_52 = arith.constant 0 : index
    %40 = vector.load %arg14[%c0_51, %c0_52] : memref<1x32xf32, #tpu.memory_space<vmem>>, vector<1x32xf32>
    %41 = vector.broadcast %40 : vector<1x32xf32> to vector<2x32xf32>
    %42 = arith.addf %39, %41 : vector<2x32xf32>
    %43 = math.tanh %42 : vector<2x32xf32>
    %c0_53 = arith.constant 0 : index
    %c0_54 = arith.constant 0 : index
    %44 = vector.load %arg17[%c0_53, %c0_54] : memref<2x32xf32, #tpu.memory_space<vmem>>, vector<2x32xf32>
    tpu.vector_store %arg17[%c0_53, %c0_54], %43 {strides = array<i32>} : memref<2x32xf32, #tpu.memory_space<vmem>>, vector<2x32xf32>,
    return
  }
}

</mosaic_0001>

<bundles_post_ra>
// kernel: _seq2seq_core.3
= control target key start
LH: loop header
LB: loop body
LE: loop exit
PB: predicated region body
PF: predicated region fallthrough
CT: control target
= control target key end

     0   :  { %s1358_s0 = inlined_call_operand.vmem [shape: f32[8,2,1], index: 0, kind: input, shape index: {}]   ;;  %s1359_s1 = inlined_call_operand.vmem [shape: f32[8,1,1], index: 1, kind: input, shape index: {}]   ;;  %s1360_s2 = inlined_call_operand.vmem [shape: f32[2,8,64], index: 2, kind: input, shape index: {}]   ;;  %s1361_s3 = inlined_call_operand.vmem [shape: f32[2,8,32], index: 3, kind: input, shape index: {}]   ;;  %s1362_s4 = inlined_call_operand.vmem [shape: f32[2,32], index: 4, kind: input, shape index: {}]   ;;  %s1363_s5 = inlined_call_operand.vmem [shape: f32[40,16], index: 5, kind: input, shape index: {}]   ;;  %s1364_s6 = inlined_call_operand.vmem [shape: f32[32,32], index: 6, kind: input, shape index: {}]   ;;  %s1365_s7 = inlined_call_operand.vmem [shape: f32[1,32], index: 7, kind: input, shape index: {}]   ;;  %s1366_s8 = inlined_call_operand.vmem [shape: f32[3,16,32], index: 8, kind: input, shape index: {}]   ;;  %s1367_s9 = inlined_call_operand.vmem [shape: f32[3,64,32], index: 9, kind: input, shape index: {}]   ;;  %s1368_s10 = inlined_call_operand.vmem [shape: f32[3,32,32], index: 10, kind: input, shape index: {}]   ;;  %s1369_s11 = inlined_call_operand.vmem [shape: f32[2,1,32], index: 11, kind: input, shape index: {}]   ;;  %s1370_s12 = inlined_call_operand.vmem [shape: f32[2,1,32], index: 12, kind: input, shape index: {}]   ;;  %s1371_s13 = inlined_call_operand.vmem [shape: f32[32,40], index: 13, kind: input, shape index: {}]   ;;  %s1372_s14 = inlined_call_operand.vmem [shape: f32[64,40], index: 14, kind: input, shape index: {}]   ;;  %s1373_s15 = inlined_call_operand.vmem [shape: f32[16,40], index: 15, kind: input, shape index: {}]   ;;  %s1374_s16 = inlined_call_operand.vmem [shape: f32[1,40], index: 16, kind: input, shape index: {}]   ;;  %s1375_s17 = inlined_call_operand.vmem [shape: f32[8,2,40], index: 17, kind: output, shape index: {0}]   ;;  %s1376_s18 = inlined_call_operand.hbm [shape: f32[7,2,8], index: 18, kind: output, shape index: {1}]  }
   0x1   :  { %1378 = sst [smem:[#allocation5_spill]] %s1358_s0 }
   0x2   :  { %1379 = sst [smem:[#allocation6_spill]] %s1359_s1 }
   0x3   :  { %1380 = sst [smem:[#allocation7_spill]] %s1360_s2 }
   0x4   :  { %24 = vsyncpa [#allocation3], 0  ;;  %s1381_s29 = sld [smem:[#allocation7_spill]]  ;;  %v80_v2 = vlaneseq  ;;  %vm83_vm0 = vcmask 320512   ;;  %v989_v3 = vld [vmem:[%s1361_s3] sm:$0xff]  ;;  %v994_v4 = vld [vmem:[%s1361_s3 + $0x8] sm:$0xff] }
   0x5   :  { %v999_v5 = vld [vmem:[%s1363_s5] sm:$0xff]  ;;  %v875_v6 = vmov 0.0   ;;  %v1008_v7 = vld [vmem:[%s1363_s5 + $0x8] sm:$0xff]  ;;  %v1013_v8 = vld [vmem:[%s1363_s5 + $0x10] sm:$0xff]  ;;  %s1382_s22 = sld [smem:[#allocation5_spill]]  ;;  %s1088_s2 = smov 1  }
   0x6   :  { %84 = vst.msk [vmem:[%s1375_s17] sm:$0x3] %vm83_vm0, %v875_v6  ;;  %v1018_v9 = vld [vmem:[%s1363_s5 + $0x18] sm:$0xff]  ;;  %v1020_v10 = vand.u32 127, %v80_v2  ;;  %v1025_v11 = vld [vmem:[%s1363_s5 + $0x20] sm:$0xff]  ;;  %v1035_v13 = vld [vmem:[%s1364_s6 + $0x8] sm:$0xff] }
   0x7   :  { %v1030_v12 = vld [vmem:[%s1364_s6] sm:$0xff]  ;;  %v1040_v14 = vld [vmem:[%s1364_s6 + $0x10] sm:$0xff]  ;;  %v1045_v15 = vld [vmem:[%s1364_s6 + $0x18] sm:$0xff] }
   0x8   :  { %v1050_v16 = vld [vmem:[%s1365_s7] sm:$0x1]  ;;  %v82_v17 = vcvt.s32.f32 %v1020_v10  ;;  %v1061_v19 = vld [vmem:[%s1369_s11 + $0x1] sm:$0x1] }
   0x9   :  { %v1056_v18 = vld [vmem:[%s1369_s11] sm:$0x1]  ;;  %v1071_v21 = vld [vmem:[%s1370_s12 + $0x1] sm:$0x1] }
   0xa   :  { %v979_v0 = vld [vmem:[%s1381_s29] sm:$0xff]  ;;  %v984_v1 = vld [vmem:[%s1381_s29 + $0x8] sm:$0xff] }
   0xb   :  { %v1066_v20 = vld [vmem:[%s1370_s12] sm:$0x1] }
   0xc   :  { %v1076_v22 = vld [vmem:[%s1374_s16] sm:$0x1] }
   0xd   :  { %v85_v23 = vld [vmem:[%s1362_s4] sm:$0x3]  }
   0xe   :  { %v86_v24 = vld [vmem:[%s1382_s22] sm:$0x3]  }
   0xf LB: > { %143 = vmatpush.msra.mxu1 %v1045_v15  ;;  %118 = vmatpush.msra.mxu0 %v1025_v11  ;;  %vm127_vm1 = vcmask 261120   ;;  %v162_v31 = vperm.slane %v1050_v16, 0  ;;  %vm176_vm2 = vcmask 1041409   ;;  %vm179_vm3 = vcmask 58368   ;;  %v272_v63 = vld [vmem:[%s1366_s8 + $0x8] sm:$0xff]  ;;  %s768_s19 = sadd.s32 4294967295, %s873_s2  ;;  %s873_s2 = sphi %s1088_s2, %s92_s2   ;;  %v869_v23 = vphi %v85_v23, %v569_v23   ;;  %v865_v24 = vphi %v86_v24, %v679_v24  }
  0x10   : > { %v876_v44 = vmov 0   ;;  %vm103_vm4 = vcmask 326656   ;;  %v877_v61 = vmov 0.0   ;;  %324 = vmatpush.msra.mxu3 %v272_v63  ;;  %vm306_vm14 = vcmask 130048   ;;  %v741_v63 = vld [vmem:[%s1368_s10 + $0x20] sm:$0xff]  ;;  %s769_s1 = sshll.u32 %s768_s19, 1 }
  0x11   : > { %144 = vmatpush.msra.mxu1 %v1040_v14  ;;  %119 = vmatpush.msra.mxu0 %v1018_v9  ;;  %vm256_vm15 = vcmask 523264   ;;  %s661_s20 = scalar_lea.vmem [#allocation2], %s769_s1  ;;  %s767_s5 = sshll.u32 %s873_s2, 1 }
  0x12   : > { %801 = vset.pattern.permute.xlu2 %v876_v44  ;;  %800 = vset.pattern.permute.xlu1 %v876_v44  ;;  %s653_s27 = scalar_lea.vmem %s1375_s17, %s767_s5  ;;  %s1383_s29 = sld [smem:[#allocation6_spill]] }
  0x13   : > { %145 = vmatpush.msra.mxu1 %v1035_v13  ;;  %120 = vmatpush.msra.mxu0 %v1013_v8  ;;  %s1384_s0 = sld [smem:[#allocation5_spill]] }
  0x14   : > { %802 = vset.pattern.permute.xlu0 %v876_v44 }
  0x15   : > { %146 = vmatpush.msra.mxu1 %v1030_v12  ;;  %121 = vmatpush.msra.mxu0 %v1008_v7 }
  0x16   : > { %724 = vmatmul.msk.f32.vlgmr.msra.gmra.mxu1 %vm127_vm1, %v869_v23 }
  0x17   : > { %122 = vmatpush.msra.mxu0 %v999_v5 }
  0x18   : > { %s671_s6 = scalar_lea.vmem %s1383_s29, %s873_s2  ;;  %s92_s2 = sadd.s32 1, %s873_s2  }
  0x19   : > { %s674_s19 = scalar_lea.vmem %s1384_s0, %s767_s5  ;;  %p89_p0 = scmp.ge.s32.totalorder %s92_s2, 8  }
  0x1a   :  { %s688_s11 = sshll.u32 (%p89_p0), %s1376_s18, 4  ;;  %s878_s21 = smov (%p89_p0), [#allocation2]   ;;  %s689_s11 = int_to_ptr.hbm [resolvable:$true] %s688_s11 }
  0x1b   :  { %s686_s22 = sshll.u32 (%p89_p0), %s878_s21, 4  ;;  %s879_s4 = smov (%p89_p0), 32   ;;  %s687_s22 = int_to_ptr.vmem [resolvable:$true] %s686_s22 }
  0x1c   :  { %s880_s12 = smov (%p89_p0), 2  }
  0x93   : > { %v148_v25 = vpop.f32.mrf.mxu1 }
  0x94   : > { %v152_v26 = vrot.slane %v148_v25, 1  ;;  %v153_v27 = vperm.slane %v148_v25, 0 }
  0x96   : > { %v154_v28 = vperm.slane %v152_v26, 0  ;;  %v157_v29 = vadd.f32 %v153_v27, %v989_v3 }
  0x98   : > { %v158_v30 = vadd.f32 %v154_v28, %v994_v4  ;;  %803 = vtanh.f32 %v157_v29 }
  0x9a   : > { %805 = vtanh.f32 %v158_v30 }
  0x9e   : > { %v804_v32 = vpop.eup %803 }
  0x9f   : > { %v164_v33 = vmul.f32 %v804_v32, %v162_v31 }
  0xa0   : > { %v806_v35 = vpop.eup %805 }
  0xa1   : > { %v166_v34 = vsel %vm127_vm1, %v164_v33, 0.0  ;;  %v165_v36 = vmul.f32 %v806_v35, %v162_v31 }
  0xa2   : > { %167 = vadd.xlane.f32.xlu0 %v166_v34 }
  0xa3   : > { %v169_v37 = vsel %vm127_vm1, %v165_v36, 0.0 }
  0xaa   : > { %170 = vadd.xlane.f32.xlu0 %v169_v37 }
 0x115   : > { %v168_v38 = vpop.xlane.xlu0 %167 }
 0x116   : > { %v174_v40 = vperm.slane %v168_v38, %v1020_v10 }
 0x11d   : > { %v171_v39 = vpop.xlane.xlu0 %170 }
 0x11e   : > { %v175_v41 = vperm.slane %v171_v39, %v1020_v10 }
 0x120   : > { %v177_v42 = vsel %vm176_vm2, %v175_v41, %v174_v40 }
 0x121   : > { %v180_v43 = vsel %vm179_vm3, %v177_v42, -inf }
 0x122   : > { %181 = vmax.xlane.f32.xlu1 %v180_v43 }
 0x13b   : > { %97 = vperm.xlu1 %800, %v865_v24  }
 0x195   : > { %v182_v45 = vpop.xlane.xlu1 %181 }
 0x196   : > { %v184_v46 = vperm.slane %v182_v45, 0  ;;  %v185_v47 = vperm.slane %v182_v45, 1 }
 0x198   : > { %v188_v48 = vsub.f32 %v168_v38, %v184_v46  ;;  %v189_v50 = vsub.f32 %v171_v39, %v185_v47 }
 0x19a   : > { %v190_v49 = vmul.f32 1.442695, %v188_v48  ;;  %v192_v51 = vmul.f32 1.442695, %v189_v50  ;;  %v271_v48 = vld [vmem:[%s1366_s8] sm:$0xff]  ;;  %v333_v50 = vld [vmem:[%s1368_s10 + $0x18] sm:$0xff] }
 0x19b   : > { %325 = vmatpush.msra.mxu3 %v271_v48  ;;  %v579_v48 = vld [vmem:[%s1372_s14 + $0x28] sm:$0xff] }
 0x19c   : > { %807 = vpow2.f32 %v190_v49 }
 0x19d   : > { %809 = vpow2.f32 %v192_v51  ;;  %346 = vmatpush.msrb.mxu3 %v333_v50  ;;  %v332_v51 = vld [vmem:[%s1368_s10 + $0x10] sm:$0xff]  ;;  %v753_v50 = vld [vmem:[%s1367_s9 + $0xa0] sm:$0xff] }
 0x19f   : > { %347 = vmatpush.msrb.mxu3 %v332_v51  ;;  %v578_v51 = vld [vmem:[%s1372_s14 + $0x20] sm:$0xff] }
 0x1a2   : > { %v808_v52 = vpop.eup %807 }
 0x1a3   : > { %197 = vperm.xlu2 %801, %v808_v52   ;;  %v810_v53 = vpop.eup %809 }
 0x1ab   : > { %200 = vperm.xlu2 %801, %v810_v53  }
 0x1ad   : > { %v98_v60 = vpop.permute.xlu1 %97 }
 0x1ae   : > { %vm100_vm5 = vcmp.eq.f32.partialorder %v98_v60, %v82_v17  ;;  %v737_v60 = vld [vmem:[%s1367_s9 + $0x70] sm:$0xff] }
 0x1af   : > { %v722_v62 = vsel %vm100_vm5, 1.0, %v877_v61  ;;  %v278_v61 = vld [vmem:[%s1367_s9 + $0x28] sm:$0xff] }
 0x1b0   : > { %723 = vmatmul.msk.f32.vlgmr.msra.gmra.mxu0 %vm103_vm4, %v722_v62  ;;  %v736_v62 = vld [vmem:[%s1367_s9 + $0x68] sm:$0xff] }
 0x1fd   : > { %v198_v54 = vpop.permute.xlu2 %197 }
 0x1fe   : > { %v202_v56 = vperm.slane %v198_v54, %v1020_v10  ;;  %v744_v54 = vld [vmem:[%s1368_s10 + $0x38] sm:$0xff] }
 0x205   : > { %v201_v55 = vpop.permute.xlu2 %200 }
 0x206   : > { %v203_v57 = vperm.slane %v201_v55, %v1020_v10  ;;  %v743_v55 = vld [vmem:[%s1368_s10 + $0x30] sm:$0xff] }
 0x208   : > { %v204_v58 = vsel %vm176_vm2, %v203_v57, %v202_v56  ;;  %v280_v56 = vld [vmem:[%s1367_s9 + $0x38] sm:$0xff] }
 0x209   : > { %v206_v59 = vsel %vm179_vm3, %v204_v58, 0.0  ;;  %v738_v57 = vld [vmem:[%s1367_s9 + $0x78] sm:$0xff]  ;;  %v742_v58 = vld [vmem:[%s1368_s10 + $0x28] sm:$0xff]  ;;  %294 = vmatpush.msra.mxu2 %v280_v56 }
 0x20a   : > { %207 = vadd.xlane.f32.xlu0 %v206_v59  ;;  %398 = vmatpush.msrb.mxu1 %v738_v57  ;;  %v279_v59 = vld [vmem:[%s1367_s9 + $0x30] sm:$0xff]  ;;  %v750_v57 = vld [vmem:[%s1367_s9 + $0x88] sm:$0xff] }
 0x20b   : > { %295 = vmatpush.msra.mxu2 %v279_v59  ;;  %v749_v59 = vld [vmem:[%s1367_s9 + $0x80] sm:$0xff] }
 0x20c   : > { %399 = vmatpush.msrb.mxu1 %v737_v60  ;;  %v574_v60 = vld [vmem:[%s1372_s14] sm:$0xff] }
 0x20d   : > { %296 = vmatpush.msra.mxu2 %v278_v61 }
 0x20e   : > { %400 = vmatpush.msrb.mxu1 %v736_v62 }
 0x22d   : > { %v1132_v49 = vpop.f32.mrf.mxu0 }
 0x22e   : > { %726 = vmatmul.msk.f32.vlgmr.msra.gmra.mxu3 %vm306_vm14, %v1132_v49 }
 0x27d   : > { %v208_v2 = vpop.xlane.xlu0 %207 }
 0x27e   : > { %v210_v6 = vperm.slane %v208_v2, 0  ;;  %v211_v24 = vperm.slane %v208_v2, 1  ;;  %v730_v2 = vld [vmem:[%s1366_s8 + $0x18] sm:$0xff] }
 0x27f   : > { %424 = vmatpush.msrb.mxu0 %v730_v2 }
 0x280   : > { %811 = vrcp.f32 %v210_v6  ;;  %v225_v31 = vand.u32 2147483648, %v210_v6  ;;  %v240_v32 = vand.u32 2147483648, %v211_v24  ;;  %v223_v34 = vand.u32 2147483647, %v210_v6 }
 0x281   : > { %813 = vrcp.f32 %v211_v24  ;;  %v238_v36 = vand.u32 2147483647, %v211_v24  ;;  %vm219_vm8 = vweird.f32 %v210_v6  ;;  %vm234_vm9 = vweird.f32 %v211_v24 }
 0x282   : > { %v226_v39 = vor.u32 1.1754944e-38, %v225_v31  ;;  %v241_v40 = vor.u32 1.1754944e-38, %v240_v32  ;;  %vm224_vm12 = vcmp.eq.f32.partialorder %v223_v34, 8.507059e+37  ;;  %v734_v31 = vld [vmem:[%s1367_s9 + $0x58] sm:$0xff]  ;;  %v275_v32 = vld [vmem:[%s1367_s9 + $0x10] sm:$0xff]  ;;  %v274_v34 = vld [vmem:[%s1367_s9 + $0x8] sm:$0xff] }
 0x283   : > { %vm239_vm13 = vcmp.eq.f32.partialorder %v238_v36, 8.507059e+37  ;;  %v748_v36 = vld [vmem:[%s1366_s8 + $0x28] sm:$0xff] }
 0x286   : > { %v812_v25 = vpop.eup %811 }
 0x287   : > { %v814_v26 = vpop.eup %813  ;;  %v215_v27 = vmul.f32 %v812_v25, %v210_v6  ;;  %vm220_vm6 = vweird.f32 %v812_v25  ;;  %v762_v6 = vld [vmem:[%s1368_s10 + $0x58] sm:$0xff] }
 0x288   : > { %v230_v28 = vmul.f32 %v814_v26, %v211_v24  ;;  %vm235_vm7 = vweird.f32 %v814_v26  ;;  %vm221_vm10 = vmor %vm219_vm8, %vm220_vm6  ;;  %v761_v24 = vld [vmem:[%s1368_s10 + $0x50] sm:$0xff] }
 0x289   : > { %v216_v29 = vsub.f32 1.0, %v215_v27  ;;  %vm236_vm11 = vmor %vm234_vm9, %vm235_vm7  ;;  %v735_v27 = vld [vmem:[%s1367_s9 + $0x60] sm:$0xff] }
 0x28a   : > { %v231_v30 = vsub.f32 1.0, %v230_v28  ;;  %401 = vmatpush.msrb.mxu1 %v735_v27  ;;  %v729_v28 = vld [vmem:[%s1366_s8 + $0x10] sm:$0xff] }
 0x28b   : > { %v217_v33 = vmul.f32 %v812_v25, %v216_v29  ;;  %v759_v29 = vld [vmem:[%s1368_s10 + $0x40] sm:$0xff]  ;;  %425 = vmatpush.msrb.mxu0 %v729_v28 }
 0x28c   : > { %v232_v35 = vmul.f32 %v814_v26, %v231_v30  ;;  %v276_v30 = vld [vmem:[%s1367_s9 + $0x18] sm:$0xff]  ;;  %402 = vmatpush.msrb.mxu1 %v734_v31  ;;  %740 = vmatmul.msk.f32.vlgmr.msrb.gmra.mxu0 %vm306_vm14, %v1132_v49 }
 0x28d   : > { %v218_v37 = vadd.f32 %v812_v25, %v217_v33  ;;  %v733_v33 = vld [vmem:[%s1367_s9 + $0x50] sm:$0xff]  ;;  %525 = vmatpush.msra.mxu0 %v748_v36 }
 0x28e   : > { %v233_v38 = vadd.f32 %v814_v26, %v232_v35  ;;  %403 = vmatpush.msrb.mxu1 %v733_v33  ;;  %v732_v35 = vld [vmem:[%s1367_s9 + $0x48] sm:$0xff] }
 0x28f   : > { %v222_v41 = vsel %vm221_vm10, %v812_v25, %v218_v37  ;;  %v760_v25 = vld [vmem:[%s1368_s10 + $0x48] sm:$0xff] }
 0x290   : > { %v237_v42 = vsel %vm236_vm11, %v814_v26, %v233_v38  ;;  %v227_v43 = vsel %vm224_vm12, %v226_v39, %v222_v41  ;;  %v277_v26 = vld [vmem:[%s1367_s9 + $0x20] sm:$0xff]  ;;  %404 = vmatpush.msrb.mxu1 %v732_v35  ;;  %v626_v37 = vld [vmem:[%s1373_s15 + $0x8] sm:$0xff] }
 0x291   : > { %v242_v45 = vsel %vm239_vm13, %v241_v40, %v237_v42  ;;  %v228_v46 = vmul.f32 %v808_v52, %v227_v43  ;;  %v331_v52 = vld [vmem:[%s1368_s10 + $0x8] sm:$0xff]  ;;  %297 = vmatpush.msra.mxu2 %v277_v26  ;;  %v273_v38 = vld [vmem:[%s1367_s9] sm:$0xff]  ;;  %v756_v40 = vld [vmem:[%s1367_s9 + $0xb8] sm:$0xff] }
 0x292   : > { %v243_v47 = vmul.f32 %v810_v53, %v242_v45  ;;  %348 = vmatpush.msrb.mxu3 %v331_v52  ;;  %v330_v53 = vld [vmem:[%s1368_s10] sm:$0xff]  ;;  %v581_v42 = vld [vmem:[%s1372_s14 + $0x38] sm:$0xff]  ;;  %v755_v45 = vld [vmem:[%s1367_s9 + $0xb0] sm:$0xff] }
 0x293   : > { %246 = vperm.xlu2 %801, %v228_v46   ;;  %298 = vmatpush.msra.mxu2 %v276_v30  ;;  %v731_v39 = vld [vmem:[%s1367_s9 + $0x40] sm:$0xff]  ;;  %v580_v46 = vld [vmem:[%s1372_s14 + $0x30] sm:$0xff]  ;;  %v752_v52 = vld [vmem:[%s1367_s9 + $0x98] sm:$0xff] }
 0x294   : > { %251 = vperm.xlu0 %802, %v243_v47   ;;  %349 = vmatpush.msrb.mxu3 %v330_v53  ;;  %v747_v41 = vld [vmem:[%s1366_s8 + $0x20] sm:$0xff]  ;;  %v754_v47 = vld [vmem:[%s1367_s9 + $0xa8] sm:$0xff]  ;;  %v577_v53 = vld [vmem:[%s1372_s14 + $0x18] sm:$0xff] }
 0x295   : > { %727 = vmatmul.msk.f32.vlgmr.msrb.gmra.mxu3 %vm127_vm1, %v869_v23  ;;  %299 = vmatpush.msra.mxu2 %v275_v32  ;;  %v625_v43 = vld [vmem:[%s1373_s15] sm:$0xff] }
 0x296   : > { %447 = vmatpush.msra.mxu3 %v744_v54  ;;  %405 = vmatpush.msrb.mxu1 %v731_v39  ;;  %v751_v54 = vld [vmem:[%s1367_s9 + $0x90] sm:$0xff] }
 0x297   : > { %300 = vmatpush.msra.mxu2 %v274_v34  ;;  %526 = vmatpush.msra.mxu0 %v747_v41 }
 0x298   : > { %448 = vmatpush.msra.mxu3 %v743_v55  ;;  %590 = vmatpush.msra.mxu1 %v581_v42  ;;  %v576_v55 = vld [vmem:[%s1372_s14 + $0x10] sm:$0xff] }
 0x299   : > { %301 = vmatpush.msra.mxu2 %v273_v38  ;;  %758 = vmatmul.msk.f32.vlgmr.msra.gmra.mxu0 %vm306_vm14, %v1132_v49 }
 0x29a   : > { %449 = vmatpush.msra.mxu3 %v742_v58  ;;  %591 = vmatpush.msra.mxu1 %v580_v46  ;;  %v575_v58 = vld [vmem:[%s1372_s14 + $0x8] sm:$0xff] }
 0x29b   : > { %499 = vmatpush.msrb.mxu2 %v756_v40 }
 0x29c   : > { %450 = vmatpush.msra.mxu3 %v741_v63  ;;  %592 = vmatpush.msra.mxu1 %v579_v48 }
 0x29d   : > { %745 = vmatmul.msk.f32.vlgmr.msra.gmra.mxu3 %vm127_vm1, %v869_v23  ;;  %500 = vmatpush.msrb.mxu2 %v755_v45  ;;  %v457_v45 = vperm.slane %v1061_v19, 0 }
 0x29e   : > { %555 = vmatpush.msrb.mxu3 %v762_v6  ;;  %593 = vmatpush.msra.mxu1 %v578_v51 }
 0x29f   : > { %501 = vmatpush.msrb.mxu2 %v754_v47 }
 0x2a0   : > { %556 = vmatpush.msrb.mxu3 %v761_v24  ;;  %594 = vmatpush.msra.mxu1 %v577_v53 }
 0x2a1   : > { %502 = vmatpush.msrb.mxu2 %v753_v50 }
 0x2a2   : > { %557 = vmatpush.msrb.mxu3 %v760_v25  ;;  %595 = vmatpush.msra.mxu1 %v576_v55 }
 0x2a3   : > { %503 = vmatpush.msrb.mxu2 %v752_v52  ;;  %v356_v52 = vperm.slane %v1056_v18, 0 }
 0x2a4   : > { %558 = vmatpush.msrb.mxu3 %v759_v29  ;;  %596 = vmatpush.msra.mxu1 %v575_v58  ;;  %v573_v58 = vld [vmem:[%s1371_s13 + $0x18] sm:$0xff] }
 0x2a5   : > { %763 = vmatmul.msk.f32.vlgmr.msrb.gmra.mxu3 %vm127_vm1, %v869_v23  ;;  %504 = vmatpush.msrb.mxu2 %v751_v54 }
 0x2a6   : > { %641 = vmatpush.msra.mxu3 %v626_v37  ;;  %597 = vmatpush.msra.mxu1 %v574_v60  ;;  %v571_v60 = vld [vmem:[%s1371_s13 + $0x8] sm:$0xff] }
 0x2a7   : > { %505 = vmatpush.msrb.mxu2 %v750_v57  ;;  %617 = vmatpush.msrb.mxu0 %v573_v58 }
 0x2a8   : > { %642 = vmatpush.msra.mxu3 %v625_v43 }
 0x2a9   : > { %506 = vmatpush.msrb.mxu2 %v749_v59  ;;  %v572_v59 = vld [vmem:[%s1371_s13 + $0x10] sm:$0xff] }
 0x2aa   : > { %618 = vmatpush.msrb.mxu0 %v572_v59 }
 0x2ac   : > { %619 = vmatpush.msrb.mxu0 %v571_v60  ;;  %v649_v60 = vperm.slane %v1076_v22, 0 }
 0x2ad   : > { %766 = vmatmul.msk.f32.vlgmr.msra.gmra.mxu3 %vm306_vm14, %v1132_v49 }
 0x2b1   : > { %v327_v39 = vpop.f32.mrf.mxu3 }
 0x2ed   : > { %v247_v49 = vpop.permute.xlu2 %246 }
 0x2ee   : > { %v254_v56 = vmul.f32 %v247_v49, %v979_v0  ;;  %v656_v6 = vperm.slane %v247_v49, %v1020_v10 }
 0x2f0   : > { %v257_v61 = vsel %vm256_vm15, %v254_v56, 0.0 }
 0x2f1   : > { %v258_v62 = vrot.slane %v257_v61, 4 }
 0x2f3   : > { %v259_v63 = vadd.f32 %v258_v62, %v257_v61  ;;  %v570_v61 = vld [vmem:[%s1371_s13] sm:$0xff] }
 0x2f4   : > { %620 = vmatpush.msrb.mxu0 %v570_v61 }
 0x2f5   : > { %v260_v26 = vrot.slane %v259_v63, 2 }
 0x2f7   : > { %v261_v30 = vadd.f32 %v260_v26, %v259_v63  ;;  %v541_v26 = vperm.slane %v1071_v21, 0 }
 0x2f9   : > { %v262_v33 = vrot.slane %v261_v30, 1 }
 0x2fb   : > { %v263_v37 = vadd.f32 %v262_v33, %v261_v30 }
 0x306   : > { %v252_v2 = vpop.permute.xlu0 %251 }
 0x307   : > { %v255_v24 = vmul.f32 %v252_v2, %v984_v1  ;;  %v657_v25 = vperm.slane %v252_v2, %v1020_v10 }
 0x309   : > { %v264_v27 = vsel %vm256_vm15, %v255_v24, 0.0  ;;  %v658_v28 = vsel %vm176_vm2, %v657_v25, %v656_v6  ;;  %v427_v41 = vpop.f32.mrf.mxu0 }
 0x30a   : > { %v265_v29 = vrot.slane %v264_v27, 4  ;;  %662 = vst.msk [vmem:[%s661_s20] sm:$0x3] %vm179_vm3, %v658_v28 }
 0x30b   :  { %694 = dma.vmem_to_hbm [thread:$0]  (%p89_p0), %s687_s22, 224, %s689_s11, [#allocation3], %s879_s4, %s879_s4, %s880_s12  }
 0x30c   : > { %v266_v31 = vadd.f32 %v265_v29, %v264_v27 }
 0x30e   : > { %v267_v32 = vrot.slane %v266_v31, 2 }
 0x310   : > { %v268_v34 = vadd.f32 %v267_v32, %v266_v31 }
 0x312   : > { %v269_v35 = vrot.slane %v268_v34, 1 }
 0x314   : > { %v270_v36 = vadd.f32 %v269_v35, %v268_v34 }
 0x316   : > { %v283_v38 = vsel %vm176_vm2, %v270_v36, %v263_v37  ;;  %v528_v35 = vpop.f32.mrf.mxu0 }
 0x317   : > { %725 = vmatmul.msk.f32.vlgmr.msra.gmra.mxu2 %vm256_vm15, %v283_v38  ;;  %739 = vmatmul.msk.f32.vlgmr.msrb.gmra.mxu1 %vm256_vm15, %v283_v38 }
 0x318   : > { %v351_v40 = vpop.f32.mrf.mxu3 }
 0x31f   : > { %757 = vmatmul.msk.f32.vlgmr.msrb.gmra.mxu2 %vm256_vm15, %v283_v38  ;;  %764 = vmatmul.msk.f32.vlgmr.msra.gmra.mxu1 %vm256_vm15, %v283_v38 }
 0x320   : > { %v452_v46 = vpop.f32.mrf.mxu3 }
 0x328   : > { %v560_v31 = vpop.f32.mrf.mxu3 }
 0x329   : > { %v561_v34 = vadd.f32 %v560_v31, %v541_v26  ;;  %v672_v26 = vld [vmem:[%s671_s6] sm:$0x1] }
 0x32a   : > { %vm673_vm10 = vcmp.gt.f32.partialorder %v672_v26, 0.5 }
 0x330   : > { %v644_v61 = vpop.f32.mrf.mxu3 }
 0x394   : > { %v407_v42 = vpop.f32.mrf.mxu1 }
 0x395   : > { %v428_v43 = vadd.f32 %v427_v41, %v407_v42 }
 0x397   : > { %v455_v47 = vadd.f32 %v452_v46, %v428_v43 }
 0x399   : > { %v459_v48 = vadd.f32 %v457_v45, %v455_v47 }
 0x39a   : > { %v303_v50 = vpop.f32.mrf.mxu2 }
 0x39b   : > { %v746_v51 = vmul.f32 -1.442695, %v459_v48  ;;  %v328_v49 = vadd.f32 %v327_v39, %v303_v50  ;;  %v532_v39 = vperm.slane %v1066_v20, 0 }
 0x39c   : > { %v599_v58 = vpop.f32.mrf.mxu1 }
 0x39d   : > { %815 = vpow2.f32 %v746_v51  ;;  %v354_v53 = vadd.f32 %v351_v40, %v328_v49 }
 0x39f   : > { %v358_v54 = vadd.f32 %v356_v52, %v354_v53 }
 0x3a1   : > { %v728_v55 = vmul.f32 -1.442695, %v358_v54 }
 0x3a2   : > { %v508_v30 = vpop.f32.mrf.mxu2 }
 0x3a3   : > { %v816_v56 = vpop.eup %815  ;;  %817 = vpow2.f32 %v728_v55  ;;  %v529_v38 = vadd.f32 %v528_v35, %v508_v30 }
 0x3a4   : > { %v463_v57 = vadd.f32 1.0, %v816_v56 }
 0x3a5   : > { %v534_v46 = vadd.f32 %v532_v39, %v529_v38 }
 0x3a6   : > { %819 = vrcp.f32 %v463_v57  ;;  %v475_v45 = vand.u32 2147483648, %v463_v57  ;;  %vm469_vm7 = vweird.f32 %v463_v57  ;;  %v473_v48 = vand.u32 2147483647, %v463_v57 }
 0x3a8   : > { %v476_v49 = vor.u32 1.1754944e-38, %v475_v45  ;;  %vm474_vm9 = vcmp.eq.f32.partialorder %v473_v48, 8.507059e+37 }
 0x3a9   : > { %v818_v62 = vpop.eup %817 }
 0x3aa   : > { %v362_v63 = vadd.f32 1.0, %v818_v62 }
 0x3ac   : > { %821 = vrcp.f32 %v362_v63  ;;  %v820_v2 = vpop.eup %819  ;;  %v374_v29 = vand.u32 2147483648, %v362_v63  ;;  %v372_v33 = vand.u32 2147483647, %v362_v63  ;;  %vm368_vm3 = vweird.f32 %v362_v63 }
 0x3ad   : > { %v465_v6 = vmul.f32 %v820_v2, %v463_v57  ;;  %vm470_vm6 = vweird.f32 %v820_v2 }
 0x3ae   : > { %v375_v40 = vor.u32 1.1754944e-38, %v374_v29  ;;  %vm373_vm5 = vcmp.eq.f32.partialorder %v372_v33, 8.507059e+37  ;;  %vm471_vm8 = vmor %vm469_vm7, %vm470_vm6  ;;  %v675_v29 = vld [vmem:[%s674_s19] sm:$0x3] }
 0x3af   : > { %v466_v27 = vsub.f32 1.0, %v465_v6 }
 0x3b1   : > { %v467_v36 = vmul.f32 %v820_v2, %v466_v27  ;;  %v676_v27 = vsel %vm673_vm10, 1, %v876_v44 }
 0x3b2   : > { %v822_v24 = vpop.eup %821 }
 0x3b3   : > { %v364_v25 = vmul.f32 %v822_v24, %v362_v63  ;;  %vm369_vm2 = vweird.f32 %v822_v24  ;;  %v468_v43 = vadd.f32 %v820_v2, %v467_v36 }
 0x3b4   : > { %vm370_vm4 = vmor %vm368_vm3, %vm369_vm2 }
 0x3b5   : > { %v365_v28 = vsub.f32 1.0, %v364_v25  ;;  %v472_v51 = vsel %vm471_vm8, %v820_v2, %v468_v43 }
 0x3b6   : > { %v477_v52 = vsel %vm474_vm9, %v476_v49, %v472_v51 }
 0x3b7   : > { %v366_v32 = vmul.f32 %v822_v24, %v365_v28  ;;  %v566_v53 = vsub.f32 1.0, %v477_v52  ;;  %v568_v56 = vmul.f32 %v869_v23, %v477_v52  ;;  %v677_v28 = vperm.slane %v676_v27, 0 }
 0x3b9   : > { %v367_v37 = vadd.f32 %v822_v24, %v366_v32  ;;  %vm678_vm11 = vcmp.eq.s32.totalorder %v677_v28, 1 }
 0x3bb   : > { %v371_v41 = vsel %vm370_vm4, %v822_v24, %v367_v37 }
 0x3bc   : > { %v376_v42 = vsel %vm373_vm5, %v375_v40, %v371_v41 }
 0x3bd   : > { %v563_v47 = vmul.f32 %v561_v34, %v376_v42 }
 0x3bf   : > { %v564_v50 = vadd.f32 %v563_v47, %v534_v46 }
 0x3c1   : > { %823 = vtanh.f32 %v564_v50 }
 0x3c7   : > { %v824_v54 = vpop.eup %823 }
 0x3c8   : > { %v567_v55 = vmul.f32 %v824_v54, %v566_v53 }
 0x3ca   : > { %v569_v23 = vadd.f32 %v568_v56, %v567_v55  }
 0x3cc   : > { %765 = vmatmul.msk.f32.vlgmr.msrb.gmra.mxu0 %vm127_vm1, %v569_v23 }
 0x449   : > { %v622_v59 = vpop.f32.mrf.mxu0 }
 0x44a   : > { %v623_v57 = vadd.f32 %v622_v59, %v599_v58 }
 0x44c   : > { %v647_v62 = vadd.f32 %v644_v61, %v623_v57 }
 0x44e   : > { %v651_v63 = vadd.f32 %v649_v60, %v647_v62 }
 0x450   : > { %v663_v2 = vsel %vm83_vm0, %v651_v63, -inf  ;;  %654 = vst.msk [vmem:[%s653_s27] sm:$0x3] %vm83_vm0, %v651_v63 }
 0x451   : > { %664 = vmax.xlane.f32.xlu2 %v663_v2 }
 0x4c4   : > { %v665_v6 = vpop.xlane.xlu2 %664 }
 0x4c5   : > { %vm666_vm1 = vcmp.eq.f32.partialorder %v651_v63, %v665_v6 }
 0x4c6   : > { %v667_v24 = vsel %vm666_vm1, %v82_v17, 40.0 }
 0x4c7   : > { %v668_v25 = vsel %vm83_vm0, %v667_v24, inf }
 0x4c8   : > { %669 = vmin.xlane.f32.xlu1 %v668_v25 }
 0x538   :  { %91 = sbr.rel (!%p89_p0) target bundleno = 15 (0xf), region = 115 }
 0x53b   : > { %v670_v30 = vpop.xlane.xlu1 %669 }
 0x53c   : > { %v679_v24 = vsel %vm678_vm11, %v675_v29, %v670_v30  }
 0x53d   :  { %861 = dma.done.wait [#allocation3], 224  }
 0x53e   :  { %862 = vsyncadd [#allocation3], 4294967072 }
 0x53f   :  { %701 = vsyncpa [#allocation3], 1 }

// kernel: _seq2seq_core.2
= control target key start
LH: loop header
LB: loop body
LE: loop exit
PB: predicated region body
PF: predicated region fallthrough
CT: control target
= control target key end

     0   :  { %s1541_s0 = inlined_call_operand.vmem [shape: f32[8,2,16], index: 0, kind: input, shape index: {}]   ;;  %s1542_s1 = inlined_call_operand.vmem [shape: f32[3,16,32], index: 1, kind: input, shape index: {}]   ;;  %s1543_s2 = inlined_call_operand.vmem [shape: f32[3,32,32], index: 2, kind: input, shape index: {}]   ;;  %s1544_s3 = inlined_call_operand.vmem [shape: f32[2,1,32], index: 3, kind: input, shape index: {}]   ;;  %s1545_s4 = inlined_call_operand.vmem [shape: f32[2,1,32], index: 4, kind: input, shape index: {}]   ;;  %s1546_s5 = inlined_call_operand.vmem [shape: f32[3,16,32], index: 5, kind: input, shape index: {}]   ;;  %s1547_s6 = inlined_call_operand.vmem [shape: f32[3,32,32], index: 6, kind: input, shape index: {}]   ;;  %s1548_s7 = inlined_call_operand.vmem [shape: f32[2,1,32], index: 7, kind: input, shape index: {}]   ;;  %s1549_s8 = inlined_call_operand.vmem [shape: f32[2,1,32], index: 8, kind: input, shape index: {}]   ;;  %s1550_s9 = inlined_call_operand.hbm [shape: f32[32,32], index: 9, kind: input, shape index: {}]   ;;  %s1551_s10 = inlined_call_operand.hbm [shape: f32[32,32], index: 10, kind: input, shape index: {}]   ;;  %s1552_s11 = inlined_call_operand.vmem [shape: f32[1,32], index: 11, kind: input, shape index: {}]   ;;  %s1553_s12 = inlined_call_operand.hbm [shape: f32[32,32], index: 12, kind: input, shape index: {}]   ;;  %s1554_s13 = inlined_call_operand.hbm [shape: f32[32,32], index: 13, kind: input, shape index: {}]   ;;  %s1555_s14 = inlined_call_operand.vmem [shape: f32[1,32], index: 14, kind: input, shape index: {}]   ;;  %s1556_s15 = inlined_call_operand.vmem [shape: f32[8,2,64], index: 15, kind: output, shape index: {0}]   ;;  %s1557_s16 = inlined_call_operand.vmem [shape: f32[8,2,32], index: 16, kind: output, shape index: {1}]   ;;  %s1558_s17 = inlined_call_operand.vmem [shape: f32[2,32], index: 17, kind: output, shape index: {2}]  }
   0x1   :  { %1561 = sst [smem:[#allocation14_spill]] %s1541_s0 }
   0x2   :  { %1562 = sst [smem:[#allocation15_spill]] %s1542_s1 }
   0x3   :  { %23 = vsyncpa [#allocation5], 0 }
   0x4   :  { %24 = vsyncpa [#allocation7], 0 }
   0x5   :  { %25 = vsyncpa [#allocation10], 0  ;;  %s61_s26 = sshll.u32 %s1551_s10, 4  ;;  %s1091_s27 = smov [#allocation6]   ;;  %s62_s26 = int_to_ptr.hbm [resolvable:$true] %s61_s26 }
   0x6   :  { %s63_s28 = sshll.u32 %s1091_s27, 4  ;;  %s48_s30 = sshll.u32 %s1550_s9, 4  ;;  %s64_s28 = int_to_ptr.vmem [resolvable:$true] %s63_s28  ;;  %s49_s30 = int_to_ptr.hbm [resolvable:$true] %s48_s30 }
   0x7   :  { %s1092_s18 = smov 128   ;;  %s1093_s19 = smov 8  }
   0x8   :  { %69 = dma.hbm_to_vmem [thread:$0]  %s62_s26, 512, %s64_s28, [#allocation7], %s1092_s18, %s1092_s18, %s1093_s19  }
   0x9   :  { %s1094_s1 = smov [#allocation4]   ;;  %s76_s23 = sshll.u32 %s1553_s12, 4  ;;  %s77_s23 = int_to_ptr.hbm [resolvable:$true] %s76_s23 }
   0xa   :  { %s50_s20 = sshll.u32 %s1094_s1, 4  ;;  %s89_s25 = sshll.u32 %s1554_s13, 4  ;;  %s51_s20 = int_to_ptr.vmem [resolvable:$true] %s50_s20  ;;  %s90_s25 = int_to_ptr.hbm [resolvable:$true] %s89_s25 }
   0xb   :  { %56 = dma.hbm_to_vmem [thread:$0]  %s49_s30, 512, %s51_s20, [#allocation5], %s1092_s18, %s1092_s18, %s1093_s19  }
   0xc   :  { %s1095_s27 = smov [#allocation8]   ;;  %s1096_s9 = smov [#allocation9]  }
   0xd   :  { %s78_s29 = sshll.u32 %s1095_s27, 4  ;;  %s91_s26 = sshll.u32 %s1096_s9, 4  ;;  %s79_s29 = int_to_ptr.vmem [resolvable:$true] %s78_s29  ;;  %s92_s26 = int_to_ptr.vmem [resolvable:$true] %s91_s26 }
   0xe   :  { %84 = dma.hbm_to_vmem [thread:$0]  %s77_s23, 512, %s79_s29, [#allocation7], %s1092_s18, %s1092_s18, %s1093_s19  }
   0xf   :  { %97 = dma.hbm_to_vmem [thread:$0]  %s90_s25, 512, %s92_s26, [#allocation10], %s1092_s18, %s1092_s18, %s1093_s19  }
  0x10   :  { %1073 = dma.done.wait [#allocation5], 512  }
  0x11   :  { %1074 = vsyncadd [#allocation5], 4294966784 }
  0x12   :  { %1075 = dma.done.wait [#allocation7], 1024  }
  0x13   :  { %1076 = vsyncadd [#allocation7], 4294966272 }
  0x14   :  { %1077 = dma.done.wait [#allocation10], 512  }
  0x15   :  { %1078 = vsyncadd [#allocation10], 4294966784  ;;  %v1203_v0 = vld [vmem:[%s1544_s3] sm:$0x1]  ;;  %v1208_v1 = vld [vmem:[%s1544_s3 + $0x1] sm:$0x1] }
  0x16   :  { %v1213_v2 = vld [vmem:[%s1545_s4] sm:$0x1]  ;;  %v1218_v3 = vld [vmem:[%s1545_s4 + $0x1] sm:$0x1]  ;;  %v1240_v8 = vmov 0.0   ;;  %v1242_v9 = vmov 0.0  }
  0x17   :  { %v1223_v4 = vld [vmem:[%s1548_s7] sm:$0x1]  ;;  %v1228_v5 = vld [vmem:[%s1548_s7 + $0x1] sm:$0x1]  ;;  %s1244_s4 = smov 0  }
  0x18   :  { %v1233_v6 = vld [vmem:[%s1549_s8] sm:$0x1]  ;;  %v1238_v7 = vld [vmem:[%s1549_s8 + $0x1] sm:$0x1] }
  0x19 LB: > { %v144_v10 = vld [vmem:[%s1543_s2 + $0x18] sm:$0xff]  ;;  %s1563_s12 = sld [smem:[#allocation15_spill]]  ;;  %v143_v13 = vld [vmem:[%s1543_s2 + $0x10] sm:$0xff]  ;;  %v142_v16 = vld [vmem:[%s1543_s2 + $0x8] sm:$0xff]  ;;  %s862_s10 = sshll.u32 %s1089_s4, 1  ;;  %vm169_vm0 = vcmask 130048   ;;  %s1089_s4 = sphi %s1244_s4, %s133_s4   ;;  %v1085_v9 = vphi %v1242_v9, %v1567_v9   ;;  %v1081_v8 = vphi %v1240_v8, %v1566_v8  }
  0x1a   : > { %v871_v11 = vld [vmem:[%s1543_s2 + $0x38] sm:$0xff]  ;;  %161 = vmatpush.msra.mxu0 %v144_v10  ;;  %v870_v14 = vld [vmem:[%s1543_s2 + $0x30] sm:$0xff]  ;;  %v869_v18 = vld [vmem:[%s1543_s2 + $0x28] sm:$0xff]  ;;  %s1564_s7 = sld [smem:[#allocation14_spill]]  ;;  %vm145_vm1 = vcmask 261120   ;;  %s348_s1 = ssub.s32 7, %s1089_s4 }
  0x1b   : > { %236 = vmatpush.msra.mxu2 %v871_v11  ;;  %v881_v21 = vld [vmem:[%s1543_s2 + $0x58] sm:$0xff]  ;;  %v141_v22 = vld [vmem:[%s1543_s2] sm:$0xff]  ;;  %v880_v24 = vld [vmem:[%s1543_s2 + $0x50] sm:$0xff]  ;;  %s1316_s25 = sshll.u32 %s348_s1, 1  ;;  %v194_v49 = vperm.slane %v1203_v0, 0  ;;  %v265_v55 = vperm.slane %v1208_v1, 0 }
  0x1c   : > { %162 = vmatpush.msra.mxu0 %v143_v13  ;;  %v868_v23 = vld [vmem:[%s1543_s2 + $0x20] sm:$0xff]  ;;  %v353_v25 = vld [vmem:[%s1546_s5 + $0x8] sm:$0xff]  ;;  %v357_v26 = vld [vmem:[%s1547_s6 + $0x18] sm:$0xff]  ;;  %v405_v10 = vperm.slane %v1223_v4, 0  ;;  %vm560_vm12 = vcmask 254976   ;;  %s559_s28 = scalar_lea.vmem [#allocation2], %s862_s10 }
  0x1d   : > { %237 = vmatpush.msra.mxu2 %v870_v14  ;;  %v879_v28 = vld [vmem:[%s1543_s2 + $0x48] sm:$0xff]  ;;  %v352_v29 = vld [vmem:[%s1546_s5] sm:$0xff]  ;;  %v356_v30 = vld [vmem:[%s1547_s6 + $0x10] sm:$0xff]  ;;  %s133_s4 = sadd.s32 1, %s1089_s4  }
  0x1e   : > { %163 = vmatpush.msra.mxu0 %v142_v16  ;;  %v878_v32 = vld [vmem:[%s1543_s2 + $0x40] sm:$0xff]  ;;  %v892_v33 = vld [vmem:[%s1547_s6 + $0x38] sm:$0xff]  ;;  %v355_v34 = vld [vmem:[%s1547_s6 + $0x8] sm:$0xff]  ;;  %p130_p0 = scmp.ge.s32.totalorder %s133_s4, 8  }
  0x1f   : > { %v867_v12 = vld [vmem:[%s1563_s12 + $0x18] sm:$0xff]  ;;  %v866_v15 = vld [vmem:[%s1563_s12 + $0x10] sm:$0xff]  ;;  %v140_v17 = vld [vmem:[%s1563_s12 + $0x8] sm:$0xff]  ;;  %238 = vmatpush.msra.mxu2 %v869_v18  ;;  %v476_v18 = vperm.slane %v1228_v5, 0  ;;  %s1097_s2 = smov (%p130_p0), 32  }
  0x20   : > { %258 = vmatpush.msra.mxu3 %v867_v12  ;;  %s137_s8 = scalar_lea.vmem %s1564_s7, %s862_s10  ;;  %v139_v19 = vld [vmem:[%s1563_s12] sm:$0xff]  ;;  %187 = vmatpush.msra.mxu1 %v140_v17  ;;  %v876_v27 = vld [vmem:[%s1563_s12 + $0x28] sm:$0xff]  ;;  %s350_s20 = scalar_lea.vmem %s1564_s7, %s1316_s25  ;;  %v888_v35 = vld [vmem:[%s1546_s5 + $0x18] sm:$0xff] }
  0x21   : > { %v138_v20 = vld [vmem:[%s137_s8] sm:$0x3]  ;;  %164 = vmatpush.msra.mxu0 %v141_v22  ;;  %239 = vmatpush.msra.mxu2 %v868_v23  ;;  %v891_v36 = vld [vmem:[%s1547_s6 + $0x30] sm:$0xff]  ;;  %v890_v40 = vld [vmem:[%s1547_s6 + $0x28] sm:$0xff]  ;;  %s562_s10 = scalar_lea.vmem [#allocation3], %s1316_s25 }
  0x22   : > { %259 = vmatpush.msra.mxu3 %v866_v15  ;;  %188 = vmatpush.msra.mxu1 %v139_v19  ;;  %v875_v31 = vld [vmem:[%s1563_s12 + $0x20] sm:$0xff]  ;;  %v887_v39 = vld [vmem:[%s1546_s5 + $0x10] sm:$0xff]  ;;  %v902_v41 = vld [vmem:[%s1547_s6 + $0x58] sm:$0xff] }
  0x23   : > { %873 = vmatmul.msk.f32.vlgmr.msra.gmra.mxu3 %vm169_vm0, %v138_v20  ;;  %863 = vmatmul.msk.f32.vlgmr.msra.gmra.mxu0 %vm145_vm1, %v1085_v9  ;;  %v351_v37 = vld [vmem:[%s350_s20] sm:$0x3]  ;;  %v897_v42 = vld [vmem:[%s1546_s5 + $0x28] sm:$0xff]  ;;  %v901_v44 = vld [vmem:[%s1547_s6 + $0x50] sm:$0xff] }
  0x24   : > { %333 = vmatpush.msrb.mxu3 %v881_v21  ;;  %864 = vmatmul.msk.f32.vlgmr.msra.gmra.mxu1 %vm169_vm0, %v138_v20  ;;  %v354_v38 = vld [vmem:[%s1547_s6] sm:$0xff]  ;;  %v900_v46 = vld [vmem:[%s1547_s6 + $0x48] sm:$0xff]  ;;  %v635_v0 = vld [vmem:[#allocation6 + $0x8] sm:$0xff] (%p130_p0) }
  0x25   : > { %872 = vmatmul.msk.f32.vlgmr.msra.gmra.mxu2 %vm145_vm1, %v1085_v9  ;;  %373 = vmatpush.msrb.mxu0 %v357_v26  ;;  %v889_v43 = vld [vmem:[%s1547_s6 + $0x20] sm:$0xff]  ;;  %v631_v1 = vld [vmem:[#allocation4 + $0x8] sm:$0xff] (%p130_p0) }
  0x26   : > { %334 = vmatpush.msrb.mxu3 %v880_v24  ;;  %398 = vmatpush.msrb.mxu2 %v353_v25  ;;  %v896_v45 = vld [vmem:[%s1546_s5 + $0x20] sm:$0xff] }
  0x27   : > { %307 = vmatpush.msrb.mxu1 %v876_v27  ;;  %374 = vmatpush.msrb.mxu0 %v356_v30  ;;  %v899_v47 = vld [vmem:[%s1547_s6 + $0x40] sm:$0xff] }
  0x28   : > { %335 = vmatpush.msrb.mxu3 %v879_v28  ;;  %399 = vmatpush.msrb.mxu2 %v352_v29  ;;  %v319_v28 = vperm.slane %v1218_v3, 0  ;;  %v630_v3 = vld [vmem:[#allocation4] sm:$0xff] (%p130_p0) }
  0x29   : > { %308 = vmatpush.msrb.mxu1 %v875_v31  ;;  %375 = vmatpush.msrb.mxu0 %v355_v34 }
  0x2a   : > { %336 = vmatpush.msrb.mxu3 %v878_v32  ;;  %544 = vmatpush.msra.mxu2 %v902_v41 }
  0x2b   : > { %447 = vmatpush.msra.mxu1 %v892_v33  ;;  %882 = vmatmul.msk.f32.vlgmr.msrb.gmra.mxu3 %vm145_vm1, %v1085_v9  ;;  %v291_v33 = vperm.slane %v1213_v2, 0  ;;  %v634_v2 = vld [vmem:[#allocation6] sm:$0xff] (%p130_p0) }
  0x2c   : > { %469 = vmatpush.msra.mxu3 %v888_v35  ;;  %877 = vmatmul.msk.f32.vlgmr.msrb.gmra.mxu1 %vm169_vm0, %v138_v20 }
  0x2d   : > { %448 = vmatpush.msra.mxu1 %v891_v36  ;;  %885 = vmatmul.msk.f32.vlgmr.msrb.gmra.mxu2 %vm169_vm0, %v351_v37 }
  0x2e   : > { %376 = vmatpush.msrb.mxu0 %v354_v38  ;;  %470 = vmatpush.msra.mxu3 %v887_v39 }
  0x2f   : > { %884 = vmatmul.msk.f32.vlgmr.msrb.gmra.mxu0 %vm145_vm1, %v1081_v8  ;;  %449 = vmatpush.msra.mxu1 %v890_v40 }
  0x30   : > { %518 = vmatpush.msra.mxu0 %v897_v42  ;;  %545 = vmatpush.msra.mxu2 %v901_v44 }
  0x31   : > { %450 = vmatpush.msra.mxu1 %v889_v43 }
  0x32   : > { %519 = vmatpush.msra.mxu0 %v896_v45  ;;  %546 = vmatpush.msra.mxu2 %v900_v46 }
  0x33   : > { %894 = vmatmul.msk.f32.vlgmr.msra.gmra.mxu3 %vm169_vm0, %v351_v37 }
  0x34   : > { %893 = vmatmul.msk.f32.vlgmr.msra.gmra.mxu1 %vm145_vm1, %v1081_v8  ;;  %547 = vmatpush.msra.mxu2 %v899_v47 }
  0x35   : > { %903 = vmatmul.msk.f32.vlgmr.msra.gmra.mxu2 %vm145_vm1, %v1081_v8 }
  0x37   : > { %898 = vmatmul.msk.f32.vlgmr.msra.gmra.mxu0 %vm169_vm0, %v351_v37 }
  0xa0   : > { %v166_v48 = vpop.f32.mrf.mxu0 }
  0xa1   : > { %v190_v50 = vpop.f32.mrf.mxu1 }
  0xa2   : > { %v191_v51 = vadd.f32 %v190_v50, %v166_v48 }
  0xa4   : > { %v196_v52 = vadd.f32 %v194_v49, %v191_v51 }
  0xa6   : > { %v261_v53 = vpop.f32.mrf.mxu3  ;;  %v865_v54 = vmul.f32 -1.442695, %v196_v52 }
  0xa8   : > { %v241_v56 = vpop.f32.mrf.mxu2  ;;  %941 = vpow2.f32 %v865_v54 }
  0xa9   : > { %v262_v57 = vadd.f32 %v261_v53, %v241_v56  ;;  %v310_v58 = vpop.f32.mrf.mxu1 }
  0xaa   : > { %v311_v41 = vadd.f32 %v310_v58, %v291_v33 }
  0xab   : > { %v267_v59 = vadd.f32 %v265_v55, %v262_v57  ;;  %v530_v57 = vperm.slane %v1238_v7, 0 }
  0xac   : > { %v378_v62 = vpop.f32.mrf.mxu0 }
  0xad   : > { %v874_v60 = vmul.f32 -1.442695, %v267_v59 }
  0xae   : > { %v338_v61 = vpop.f32.mrf.mxu3  ;;  %v942_v63 = vpop.eup %941 }
  0xaf   : > { %943 = vpow2.f32 %v874_v60  ;;  %v200_v11 = vadd.f32 1.0, %v942_v63  ;;  %v339_v40 = vadd.f32 %v338_v61, %v319_v28 }
  0xb0   : > { %v401_v12 = vpop.f32.mrf.mxu2 }
  0xb1   : > { %v402_v13 = vadd.f32 %v401_v12, %v378_v62  ;;  %945 = vrcp.f32 %v200_v11  ;;  %v452_v15 = vpop.f32.mrf.mxu1  ;;  %vm206_vm2 = vweird.f32 %v200_v11  ;;  %v212_v27 = vand.u32 2147483648, %v200_v11 }
  0xb2   : > { %v210_v31 = vand.u32 2147483647, %v200_v11  ;;  %v502_v62 = vperm.slane %v1233_v6, 0 }
  0xb3   : > { %v407_v14 = vadd.f32 %v405_v10, %v402_v13  ;;  %v213_v37 = vor.u32 1.1754944e-38, %v212_v27 }
  0xb4   : > { %vm211_vm5 = vcmp.eq.f32.partialorder %v210_v31, 8.507059e+37 }
  0xb5   : > { %v944_v16 = vpop.eup %943  ;;  %v886_v17 = vmul.f32 -1.442695, %v407_v14 }
  0xb6   : > { %v271_v19 = vadd.f32 1.0, %v944_v16  ;;  %v472_v20 = vpop.f32.mrf.mxu3 }
  0xb7   : > { %947 = vpow2.f32 %v886_v17  ;;  %v473_v21 = vadd.f32 %v472_v20, %v452_v15  ;;  %v946_v22 = vpop.eup %945 }
  0xb8   : > { %949 = vrcp.f32 %v271_v19  ;;  %v202_v23 = vmul.f32 %v946_v22, %v200_v11  ;;  %vm207_vm3 = vweird.f32 %v946_v22  ;;  %v283_v45 = vand.u32 2147483648, %v271_v19  ;;  %v549_v59 = vpop.f32.mrf.mxu2  ;;  %v521_v11 = vpop.f32.mrf.mxu0 }
  0xb9   : > { %v478_v24 = vadd.f32 %v476_v18, %v473_v21  ;;  %vm208_vm4 = vmor %vm206_vm2, %vm207_vm3  ;;  %v281_v47 = vand.u32 2147483647, %v271_v19  ;;  %vm277_vm7 = vweird.f32 %v271_v19  ;;  %v550_v15 = vadd.f32 %v549_v59, %v530_v57 }
  0xba   : > { %v203_v25 = vsub.f32 1.0, %v202_v23  ;;  %v284_v52 = vor.u32 1.1754944e-38, %v283_v45  ;;  %v522_v21 = vadd.f32 %v521_v11, %v502_v62  ;;  %v636_v45 = vld [vmem:[#allocation6 + $0x10] sm:$0xff] (%p130_p0) }
  0xbb   : > { %v895_v26 = vmul.f32 -1.442695, %v478_v24  ;;  %vm282_vm9 = vcmp.eq.f32.partialorder %v281_v47, 8.507059e+37  ;;  %v767_v47 = vld [vmem:[#allocation9] sm:$0xff] (%p130_p0) }
  0xbc   : > { %v204_v30 = vmul.f32 %v946_v22, %v203_v25 }
  0xbd   : > { %v948_v29 = vpop.eup %947  ;;  %951 = vpow2.f32 %v895_v26 }
  0xbe   : > { %v950_v32 = vpop.eup %949  ;;  %v411_v34 = vadd.f32 1.0, %v948_v29  ;;  %v205_v36 = vadd.f32 %v946_v22, %v204_v30 }
  0xbf   : > { %v273_v35 = vmul.f32 %v950_v32, %v271_v19  ;;  %vm278_vm6 = vweird.f32 %v950_v32 }
  0xc0   : > { %953 = vrcp.f32 %v411_v34  ;;  %v209_v39 = vsel %vm208_vm4, %v946_v22, %v205_v36  ;;  %vm279_vm8 = vmor %vm277_vm7, %vm278_vm6  ;;  %v423_v58 = vand.u32 2147483648, %v411_v34  ;;  %v421_v61 = vand.u32 2147483647, %v411_v34 }
  0xc1   : > { %v274_v38 = vsub.f32 1.0, %v273_v35  ;;  %v214_v42 = vsel %vm211_vm5, %v213_v37, %v209_v39  ;;  %vm417_vm11 = vweird.f32 %v411_v34  ;;  %v770_v37 = vld [vmem:[#allocation9 + $0x18] sm:$0xff] (%p130_p0)  ;;  %v769_v39 = vld [vmem:[#allocation9 + $0x10] sm:$0xff] (%p130_p0)  ;;  %vm621_vm4 = vcmask (%p130_p0), 517376  }
  0xc2   : > { %v341_v46 = vmul.f32 %v339_v40, %v214_v42  ;;  %v424_v18 = vor.u32 1.1754944e-38, %v423_v58  ;;  %vm422_vm14 = vcmp.eq.f32.partialorder %v421_v61, 8.507059e+37  ;;  %786 = vmatpush.msra.mxu2 (%p130_p0), %v770_v37  ;;  %v765_v40 = vld [vmem:[#allocation8 + $0x10] sm:$0xff] (%p130_p0)  ;;  %v633_v42 = vld [vmem:[#allocation4 + $0x18] sm:$0xff] (%p130_p0) }
  0xc3   : > { %v952_v43 = vpop.eup %951  ;;  %v275_v44 = vmul.f32 %v950_v32, %v274_v38  ;;  %v766_v38 = vld [vmem:[#allocation8 + $0x18] sm:$0xff] (%p130_p0)  ;;  %724 = vmatpush.msra.mxu1 (%p130_p0), %v633_v42 }
  0xc4   : > { %v482_v48 = vadd.f32 1.0, %v952_v43  ;;  %v342_v50 = vadd.f32 %v341_v46, %v311_v41  ;;  %809 = vmatpush.msra.mxu3 (%p130_p0), %v766_v38  ;;  %v637_v41 = vld [vmem:[#allocation6 + $0x18] sm:$0xff] (%p130_p0)  ;;  %v768_v43 = vld [vmem:[#allocation9 + $0x8] sm:$0xff] (%p130_p0)  ;;  %787 = vmatpush.msra.mxu2 (%p130_p0), %v769_v39  ;;  %v632_v46 = vld [vmem:[#allocation4 + $0x10] sm:$0xff] (%p130_p0) }
  0xc5   : > { %v276_v49 = vadd.f32 %v950_v32, %v275_v44  ;;  %672 = vmatpush.msra.mxu0 (%p130_p0), %v637_v41  ;;  %v764_v44 = vld [vmem:[#allocation8 + $0x8] sm:$0xff] (%p130_p0)  ;;  %725 = vmatpush.msra.mxu1 (%p130_p0), %v632_v46 }
  0xc6   : > { %v954_v51 = vpop.eup %953  ;;  %955 = vrcp.f32 %v482_v48  ;;  %v494_v25 = vand.u32 2147483648, %v482_v48  ;;  %v492_v27 = vand.u32 2147483647, %v482_v48  ;;  %vm488_vm0 = vweird.f32 %v482_v48  ;;  %810 = vmatpush.msra.mxu3 (%p130_p0), %v765_v40  ;;  %788 = vmatpush.msra.mxu2 (%p130_p0), %v768_v43 }
  0xc7   : > { %v280_v53 = vsel %vm279_vm8, %v950_v32, %v276_v49  ;;  %957 = vtanh.f32 %v342_v50  ;;  %v413_v54 = vmul.f32 %v954_v51, %v411_v34  ;;  %vm418_vm10 = vweird.f32 %v954_v51  ;;  %673 = vmatpush.msra.mxu0 (%p130_p0), %v636_v45  ;;  %726 = vmatpush.msra.mxu1 (%p130_p0), %v631_v1 }
  0xc8   : > { %v285_v55 = vsel %vm282_vm9, %v284_v52, %v280_v53  ;;  %vm419_vm13 = vmor %vm417_vm11, %vm418_vm10  ;;  %v495_v31 = vor.u32 1.1754944e-38, %v494_v25  ;;  %vm493_vm3 = vcmp.eq.f32.partialorder %v492_v27, 8.507059e+37  ;;  %811 = vmatpush.msra.mxu3 (%p130_p0), %v764_v44  ;;  %789 = vmatpush.msra.mxu2 (%p130_p0), %v767_v47  ;;  %v961_v25 = vld [vmem:[%s1552_s11] ss:$0 sm:$0xff] (%p130_p0) }
  0xc9   : > { %v414_v56 = vsub.f32 1.0, %v413_v54  ;;  %v344_v10 = vsub.f32 1.0, %v285_v55  ;;  %v346_v17 = vmul.f32 %v1085_v9, %v285_v55  ;;  %674 = vmatpush.msra.mxu0 (%p130_p0), %v635_v0  ;;  %727 = vmatpush.msra.mxu1 (%p130_p0), %v630_v3 }
  0xcb   : > { %v415_v60 = vmul.f32 %v954_v51, %v414_v56  ;;  %675 = vmatpush.msra.mxu0 (%p130_p0), %v634_v2 }
  0xcc   : > { %v956_v63 = vpop.eup %955 }
  0xcd   : > { %v958_v12 = vpop.eup %957  ;;  %v484_v13 = vmul.f32 %v956_v63, %v482_v48  ;;  %v416_v14 = vadd.f32 %v954_v51, %v415_v60  ;;  %vm489_vm15 = vweird.f32 %v956_v63  ;;  %v763_v48 = vld [vmem:[#allocation8] sm:$0xff] (%p130_p0) }
  0xce   : > { %v345_v16 = vmul.f32 %v958_v12, %v344_v10  ;;  %vm490_vm2 = vmor %vm488_vm0, %vm489_vm15  ;;  %812 = vmatpush.msra.mxu3 (%p130_p0), %v763_v48 }
  0xcf   : > { %v485_v19 = vsub.f32 1.0, %v484_v13  ;;  %v420_v20 = vsel %vm419_vm13, %v954_v51, %v416_v14 }
  0xd0   : > { %v1403_v9 = vadd.f32 %v346_v17, %v345_v16   ;;  %v425_v23 = vsel %vm422_vm14, %v424_v18, %v420_v20 }
  0xd1   : > { %v486_v24 = vmul.f32 %v956_v63, %v485_v19  ;;  %v552_v26 = vmul.f32 %v550_v15, %v425_v23  ;;  %v962_v15 = vld [vmem:[%s1555_s14] ss:$0 sm:$0xff] (%p130_p0) }
  0xd2   : > { %v1565_v22 = vmov %v1403_v9 }
  0xd3   : > { %561 = vst.msk [vmem:[%s559_s28] sm:$0x3] %vm560_vm12, %v1565_v22  ;;  %v487_v28 = vadd.f32 %v956_v63, %v486_v24  ;;  %v553_v29 = vadd.f32 %v552_v26, %v522_v21  ;;  %909 = vmatmul.msk.f32.vlgmr.msra.gmra.mxu3 (%p130_p0), %vm145_vm1, %v1565_v22 }
  0xd5   : > { %v491_v30 = vsel %vm490_vm2, %v956_v63, %v487_v28  ;;  %959 = vtanh.f32 %v553_v29 }
  0xd6   : > { %v496_v9 = vsel %vm493_vm3, %v495_v31, %v491_v30 }
  0xd7   : > { %v555_v32 = vsub.f32 1.0, %v496_v9  ;;  %v557_v35 = vmul.f32 %v1081_v8, %v496_v9  ;;  %v1567_v9 = vmov %v1565_v22 }
  0xda   :  { %v564_v49 = vld [vmem:[#allocation2] sm:$0x3] (%p130_p0)  ;;  %v565_v50 = vld [vmem:[#allocation2 + $0x2] sm:$0x3] (%p130_p0)  ;;  %v566_v51 = vld [vmem:[#allocation2 + $0x4] sm:$0x3] (%p130_p0) }
  0xdb   : > { %v960_v33 = vpop.eup %959  ;;  %581 = vst.msk [vmem:[%s1556_s15] sm:$0x3] (%p130_p0), %vm560_vm12, %v564_v49  ;;  %v567_v52 = vld [vmem:[#allocation2 + $0x6] sm:$0x3] (%p130_p0)  ;;  %v568_v57 = vld [vmem:[#allocation2 + $0x8] sm:$0x3] (%p130_p0) }
  0xdc   : > { %v556_v34 = vmul.f32 %v960_v33, %v555_v32  ;;  %132 = sbr.rel (!%p130_p0) target bundleno = 25 (0x19), region = 149  ;;  %582 = vst.msk [vmem:[%s1556_s15 + $0x2] sm:$0x3] (%p130_p0), %vm560_vm12, %v565_v50  ;;  %v569_v58 = vld [vmem:[#allocation2 + $0xa] sm:$0x3] (%p130_p0) }
  0xdd   :  { %583 = vst.msk [vmem:[%s1556_s15 + $0x4] sm:$0x3] (%p130_p0), %vm560_vm12, %v566_v51  ;;  %v570_v59 = vld [vmem:[#allocation2 + $0xc] sm:$0x3] (%p130_p0)  ;;  %v571_v60 = vld [vmem:[#allocation2 + $0xe] sm:$0x3] (%p130_p0) }
  0xde   : > { %v558_v36 = vadd.f32 %v557_v35, %v556_v34   ;;  %584 = vst.msk [vmem:[%s1556_s15 + $0x6] sm:$0x3] (%p130_p0), %vm560_vm12, %v567_v52 }
  0xdf   :  { %585 = vst.msk [vmem:[%s1556_s15 + $0x8] sm:$0x3] (%p130_p0), %vm560_vm12, %v568_v57 }
  0xe0   : > { %563 = vst.msk [vmem:[%s562_s10] sm:$0x3] %vm560_vm12, %v558_v36  ;;  %v1566_v8 = vmov %v558_v36  ;;  %908 = vmatmul.msk.f32.vlgmr.msra.gmra.mxu2 (%p130_p0), %vm145_vm1, %v558_v36 }
  0xe1   :  { %586 = vst.msk [vmem:[%s1556_s15 + $0xa] sm:$0x3] %vm560_vm12, %v569_v58 }
  0xe2   :  { %587 = vst.msk [vmem:[%s1556_s15 + $0xc] sm:$0x3] %vm560_vm12, %v570_v59 }
  0xe3   :  { %588 = vst.msk [vmem:[%s1556_s15 + $0xe] sm:$0x3] %vm560_vm12, %v571_v60 }
  0xe7   :  { %v572_v4 = vld [vmem:[#allocation3] sm:$0x3]  ;;  %v573_v5 = vld [vmem:[#allocation3 + $0x2] sm:$0x3]  ;;  %v574_v6 = vld [vmem:[#allocation3 + $0x4] sm:$0x3] }
  0xe8   :  { %v575_v7 = vld [vmem:[#allocation3 + $0x6] sm:$0x3]  ;;  %638 = vst [vmem:[#allocation1] ss:$4 sm:$0xff] %v572_v4  ;;  %v576_v8 = vld [vmem:[#allocation3 + $0x8] sm:$0x3]  ;;  %601 = vrot.lane.b32.xlu1 %v574_v6, %s1097_s2  ;;  %597 = vrot.lane.b32.xlu0 %v572_v4, %s1097_s2 }
  0xe9   :  { %640 = vst [vmem:[#allocation1 + $0x1] ss:$4 sm:$0xff] %v573_v5  ;;  %605 = vrot.lane.b32.xlu2 %v576_v8, %s1097_s2  ;;  %v577_v53 = vld [vmem:[#allocation3 + $0xa] sm:$0x3]  ;;  %v578_v54 = vld [vmem:[#allocation3 + $0xc] sm:$0x3] }
  0xea   :  { %642 = vst [vmem:[#allocation1 + $0x2] ss:$4 sm:$0xff] %v574_v6  ;;  %v579_v56 = vld [vmem:[#allocation3 + $0xe] sm:$0x3] }
  0xeb   :  { %644 = vst [vmem:[#allocation1 + $0x3] ss:$4 sm:$0xff] %v575_v7 }
  0xec   :  { %646 = vst [vmem:[#allocation1 + $0x20] ss:$4 sm:$0xff] %v576_v8 }
  0xed   :  { %648 = vst [vmem:[#allocation1 + $0x21] ss:$4 sm:$0xff] %v577_v53 }
  0xee   :  { %650 = vst [vmem:[#allocation1 + $0x22] ss:$4 sm:$0xff] %v578_v54 }
  0xef   :  { %652 = vst [vmem:[#allocation1 + $0x23] ss:$4 sm:$0xff] %v579_v56 }
  0xf0   :  { %603 = vrot.lane.b32.xlu1 %v575_v7, %s1097_s2  ;;  %599 = vrot.lane.b32.xlu0 %v573_v5, %s1097_s2 }
  0xf1   :  { %607 = vrot.lane.b32.xlu2 %v577_v53, %s1097_s2 }
  0xf2   :  { %v653_v55 = vld.sshfl [vmem:[#allocation1] sm:$0xff pattern:$0x73625140] }
  0xf3   :  { %904 = vmatmul.msk.f32.vlgmr.msra.gmra.mxu0 %vm145_vm1, %v653_v55  ;;  %691 = vst [vmem:[#allocation1] ss:$4 sm:$0xff] %v564_v49 }
  0xf4   :  { %693 = vst [vmem:[#allocation1 + $0x1] ss:$4 sm:$0xff] %v565_v50 }
  0xf5   :  { %695 = vst [vmem:[#allocation1 + $0x2] ss:$4 sm:$0xff] %v566_v51 }
  0xf6   :  { %697 = vst [vmem:[#allocation1 + $0x3] ss:$4 sm:$0xff] %v567_v52  ;;  %v654_v62 = vld.sshfl [vmem:[#allocation1 + $0x20] sm:$0xff pattern:$0x73625140] }
  0xf7   :  { %699 = vst [vmem:[#allocation1 + $0x20] ss:$4 sm:$0xff] %v568_v57 }
  0xf8   :  { %611 = vrot.lane.b32.xlu1 %v579_v56, %s1097_s2  ;;  %609 = vrot.lane.b32.xlu0 %v578_v54, %s1097_s2  ;;  %701 = vst [vmem:[#allocation1 + $0x21] ss:$4 sm:$0xff] %v569_v58 }
  0xf9   :  { %703 = vst [vmem:[#allocation1 + $0x22] ss:$4 sm:$0xff] %v570_v59 }
  0xfa   :  { %705 = vst [vmem:[#allocation1 + $0x23] ss:$4 sm:$0xff] %v571_v60 }
  0xfb   :  { %905 = vmatmul.msk.f32.gmra.mxu0 %vm145_vm1, %v654_v62 }
  0xfd   :  { %v706_v61 = vld.sshfl [vmem:[#allocation1] sm:$0xff pattern:$0x73625140] }
  0xfe   :  { %906 = vmatmul.msk.f32.vlgmr.msra.gmra.mxu1 %vm145_vm1, %v706_v61 }
 0x101   :  { %v707_v63 = vld.sshfl [vmem:[#allocation1 + $0x20] sm:$0xff pattern:$0x73625140] }
 0x106   :  { %907 = vmatmul.msk.f32.gmra.mxu1 %vm145_vm1, %v707_v63 }
 0x143   :  { %v606_v12 = vpop.permute.xlu2 %605 }
 0x144   :  { %626 = vst.msk [vmem:[%s1556_s15 + $0x8] sm:$0x3] %vm621_vm4, %v606_v12 }
 0x14b   :  { %v608_v20 = vpop.permute.xlu2 %607 }
 0x14c   :  { %627 = vst.msk [vmem:[%s1556_s15 + $0xa] sm:$0x3] %vm621_vm4, %v608_v20 }
 0x156   :  { %v814_v17 = vpop.f32.mrf.mxu3 }
 0x15a   :  { %v602_v10 = vpop.permute.xlu1 %601  ;;  %v598_v11 = vpop.permute.xlu0 %597 }
 0x15b   :  { %624 = vst.msk [vmem:[%s1556_s15 + $0x4] sm:$0x3] %vm621_vm4, %v602_v10 }
 0x15c   :  { %622 = vst.msk [vmem:[%s1556_s15] sm:$0x3] %vm621_vm4, %v598_v11 }
 0x162   :  { %v604_v13 = vpop.permute.xlu1 %603  ;;  %v600_v14 = vpop.permute.xlu0 %599 }
 0x163   :  { %625 = vst.msk [vmem:[%s1556_s15 + $0x6] sm:$0x3] %vm621_vm4, %v604_v13  ;;  %v791_v16 = vpop.f32.mrf.mxu2 }
 0x164   :  { %623 = vst.msk [vmem:[%s1556_s15 + $0x2] sm:$0x3] %vm621_vm4, %v600_v14  ;;  %v815_v18 = vadd.f32 %v814_v17, %v791_v16 }
 0x166   :  { %v821_v19 = vadd.f32 %v962_v15, %v815_v18 }
 0x168   :  { %963 = vtanh.f32 %v821_v19 }
 0x16a   :  { %v612_v21 = vpop.permute.xlu1 %611  ;;  %v610_v22 = vpop.permute.xlu0 %609 }
 0x16b   :  { %629 = vst.msk [vmem:[%s1556_s15 + $0xe] sm:$0x3] %vm621_vm4, %v612_v21 }
 0x16c   :  { %628 = vst.msk [vmem:[%s1556_s15 + $0xc] sm:$0x3] %vm621_vm4, %v610_v22 }
 0x16e   :  { %v964_v23 = vpop.eup %963 }
 0x16f   :  { %823 = vst.msk [vmem:[%s1558_s17] sm:$0x3] %vm560_vm12, %v964_v23 }
 0x170   :  { %v677_v24 = vpop.f32.mrf.mxu0 }
 0x178   :  { %v680_v9 = vpop.f32.mrf.mxu0 }
 0x17b   :  { %v729_v26 = vpop.f32.mrf.mxu1 }
 0x17c   :  { %v730_v27 = vadd.f32 %v729_v26, %v677_v24 }
 0x17e   :  { %v739_v28 = vadd.f32 %v961_v25, %v730_v27 }
 0x180   :  { %v743_v29 = vrot.slane %v739_v28, 2  ;;  %v744_v30 = vrot.slane %v739_v28, 4  ;;  %v745_v31 = vrot.slane %v739_v28, 6  ;;  %755 = vst.msk [vmem:[%s1557_s16] sm:$0x3] %vm560_vm12, %v739_v28 }
 0x182   :  { %756 = vst.msk [vmem:[%s1557_s16 + $0x2] sm:$0x3] %vm560_vm12, %v743_v29 }
 0x183   :  { %757 = vst.msk [vmem:[%s1557_s16 + $0x4] sm:$0x3] %vm560_vm12, %v744_v30  ;;  %v732_v32 = vpop.f32.mrf.mxu1 }
 0x184   :  { %758 = vst.msk [vmem:[%s1557_s16 + $0x6] sm:$0x3] %vm560_vm12, %v745_v31  ;;  %v733_v33 = vadd.f32 %v732_v32, %v680_v9 }
 0x186   :  { %v740_v34 = vadd.f32 %v961_v25, %v733_v33 }
 0x188   :  { %v746_v35 = vrot.slane %v740_v34, 2  ;;  %v747_v36 = vrot.slane %v740_v34, 4  ;;  %v748_v37 = vrot.slane %v740_v34, 6  ;;  %759 = vst.msk [vmem:[%s1557_s16 + $0x8] sm:$0x3] %vm560_vm12, %v740_v34 }
 0x18a   :  { %760 = vst.msk [vmem:[%s1557_s16 + $0xa] sm:$0x3] %vm560_vm12, %v746_v35 }
 0x18b   :  { %761 = vst.msk [vmem:[%s1557_s16 + $0xc] sm:$0x3] %vm560_vm12, %v747_v36 }
 0x18c   :  { %762 = vst.msk [vmem:[%s1557_s16 + $0xe] sm:$0x3] %vm560_vm12, %v748_v37 }
 0x18d   :  { %836 = vsyncpa [#allocation5], 1 }
 0x18e   :  { %837 = vsyncpa [#allocation7], 1 }
 0x18f   :  { %838 = vsyncpa [#allocation10], 1 }

</bundles_post_ra>
